<compile_context>
chip_gen: v5e
topology: v5e:2x2
jax: 0.10.0
libtpu: 0.0.40
codegen_flags: <defaults>
</compile_context>

<pallas_src>
import functools

import jax
import jax.numpy as jnp
import numpy as np
from jax.experimental import pallas as pl
from jax.experimental.pallas import tpu as pltpu

EXPANSION = 4
BN_EPS = 1e-5
LANE = 128


def _round_up(x, m):
    return (x + m - 1) // m * m


def _plan_m(m, max_tile=512):
    """Row-tile plan: >=2 grid steps when possible (v7x TC sharding), tile a
    multiple of 8 sublanes, capped at max_tile rows for VMEM headroom."""
    tm = max(8, min(max_tile, _round_up(pl.cdiv(m, 2), 8)))
    grid = pl.cdiv(m, tm)
    return tm, grid, tm * grid


# ------------------------------ Pallas kernels ------------------------------
def conv1x1_bn_relu_kernel(x_ref, w_ref, sb_ref, o_ref):
    """o = relu((x @ w) * scale + bias); x cast to bf16 in-kernel."""
    x = x_ref[...].astype(jnp.bfloat16)
    acc = jnp.dot(x, w_ref[...], preferred_element_type=jnp.float32)
    y = acc * sb_ref[0:1, :] + sb_ref[1:2, :]
    o_ref[...] = jnp.maximum(y, 0.0).astype(o_ref.dtype)


def conv3x3_bn_relu_kernel(x_ref, w_ref, sb_ref, o_ref, *, stride, ho, wo):
    """Direct 3x3 conv (pad=1, given stride) + folded BN + ReLU.

    x_ref: (1, s, s, Hp/s, Wp/s, Cp) bf16 -- zero-padded, stride-phase-split y1.
    w_ref: (9, Cp, Cpo) bf16 per-tap weights.  sb_ref: (2, Cpo) f32 scale/bias.
    Accumulates 9 shifted MXU dots in f32; every tap load is unit-stride.
    """
    n = o_ref.shape[-1]
    acc = jnp.zeros((ho * wo, n), jnp.float32)
    for di in range(3):
        for dj in range(3):
            tap = x_ref[0, di % stride, dj % stride,
                        pl.ds(di // stride, ho), pl.ds(dj // stride, wo), :]
            acc = acc + jnp.dot(tap.reshape(ho * wo, tap.shape[-1]),
                                w_ref[di * 3 + dj],
                                preferred_element_type=jnp.float32)
    y = acc * sb_ref[0:1, :] + sb_ref[1:2, :]
    o_ref[...] = jnp.maximum(y, 0.0).reshape(o_ref.shape).astype(o_ref.dtype)


def conv3_shortcut_add_relu_kernel(y_ref, w3_ref, sb3_ref, xs_ref, wsc_ref,
                                   sbsc_ref, o_ref):
    """o = relu((y2@w3)*s3+b3 + (xs@wsc)*ssc+bsc) -- conv3 + shortcut fused."""
    main = jnp.dot(y_ref[...], w3_ref[...], preferred_element_type=jnp.float32)
    main = main * sb3_ref[0:1, :] + sb3_ref[1:2, :]
    xs = xs_ref[...].astype(jnp.bfloat16)
    sc = jnp.dot(xs, wsc_ref[...], preferred_element_type=jnp.float32)
    sc = sc * sbsc_ref[0:1, :] + sbsc_ref[1:2, :]
    o_ref[...] = jnp.maximum(main + sc, 0.0).astype(o_ref.dtype)


def conv3_add_relu_kernel(y_ref, w3_ref, sb3_ref, r_ref, o_ref):
    """o = relu((y2@w3)*s3+b3 + residual) -- identity-shortcut variant."""
    main = jnp.dot(y_ref[...], w3_ref[...], preferred_element_type=jnp.float32)
    main = main * sb3_ref[0:1, :] + sb3_ref[1:2, :]
    o_ref[...] = jnp.maximum(main + r_ref[...].astype(jnp.float32),
                             0.0).astype(o_ref.dtype)


# ------------------------------ kernel wrappers ------------------------------
_PARALLEL = pltpu.CompilerParams(dimension_semantics=("parallel",))


def fused_matmul_bn_relu(x2d, w, sb, out_dtype=jnp.bfloat16):
    """x2d: (M, K) f32, w: (K, N) bf16, sb: (2, N) f32 -> (M, N) out_dtype."""
    m, k = x2d.shape
    n = w.shape[1]
    tm, grid, m_pad = _plan_m(m)
    if m_pad != m:
        x2d = jnp.pad(x2d, ((0, m_pad - m), (0, 0)))
    out = pl.pallas_call(
        conv1x1_bn_relu_kernel,
        grid=(grid,),
        in_specs=[
            pl.BlockSpec((tm, k), lambda i: (i, 0)),
            pl.BlockSpec((k, n), lambda i: (0, 0)),     # constant: fetched once
            pl.BlockSpec((2, n), lambda i: (0, 0)),
        ],
        out_specs=pl.BlockSpec((tm, n), lambda i: (i, 0)),
        out_shape=jax.ShapeDtypeStruct((m_pad, n), out_dtype),
        compiler_params=_PARALLEL,
    )(x2d, w, sb)
    return out[:m] if m_pad != m else out


def fused_conv3x3_bn_relu(y1, w_taps, sb, stride):
    """y1: (B, H, W, Cp) bf16; w_taps: (9, Cp, Cpo) bf16; sb: (2, Cpo) f32."""
    b, h, w_, cp = y1.shape
    n = w_taps.shape[-1]
    ho = (h - 1) // stride + 1
    wo = (w_ - 1) // stride + 1
    hp_pad = _round_up(h + 2, stride)
    wp_pad = _round_up(w_ + 2, stride)
    hp2, wp2 = hp_pad // stride, wp_pad // stride
    # TODO(synk): fuse the zero-pad + phase re-layout into conv1's output
    # BlockSpec instead of a (cheap, single) XLA rearrangement pass.
    y1p = jnp.pad(y1, ((0, 0), (1, hp_pad - h - 1), (1, wp_pad - w_ - 1), (0, 0)))
    y1ph = y1p.reshape(b, hp2, stride, wp2, stride, cp).transpose(0, 2, 4, 1, 3, 5)

    # TODO(synk): tile over output rows (halo'd blocks) for very large spatial
    # maps; one whole image per grid step is plenty small here and at most
    # ResNet layer sizes.
    out = pl.pallas_call(
        functools.partial(conv3x3_bn_relu_kernel, stride=stride, ho=ho, wo=wo),
        grid=(b,),
        in_specs=[
            pl.BlockSpec((1, stride, stride, hp2, wp2, cp),
                         lambda i: (i, 0, 0, 0, 0, 0)),
            pl.BlockSpec((9, cp, n), lambda i: (0, 0, 0)),
            pl.BlockSpec((2, n), lambda i: (0, 0)),
        ],
        out_specs=pl.BlockSpec((1, ho, wo, n), lambda i: (i, 0, 0, 0)),
        out_shape=jax.ShapeDtypeStruct((b, ho, wo, n), jnp.bfloat16),
        compiler_params=_PARALLEL,
    )(y1ph, w_taps, sb)
    return out, ho, wo


def fused_conv3_shortcut(y2_2d, w3, sb3, xs2d, wsc, sbsc):
    """Final stage with projection shortcut, all fused: bf16 output."""
    m, kp = y2_2d.shape
    n = w3.shape[1]
    ksc = xs2d.shape[1]
    tm, grid, m_pad = _plan_m(m)
    if m_pad != m:
        y2_2d = jnp.pad(y2_2d, ((0, m_pad - m), (0, 0)))
        xs2d = jnp.pad(xs2d, ((0, m_pad - m), (0, 0)))
    out = pl.pallas_call(
        conv3_shortcut_add_relu_kernel,
        grid=(grid,),
        in_specs=[
            pl.BlockSpec((tm, kp), lambda i: (i, 0)),
            pl.BlockSpec((kp, n), lambda i: (0, 0)),
            pl.BlockSpec((2, n), lambda i: (0, 0)),
            pl.BlockSpec((tm, ksc), lambda i: (i, 0)),
            pl.BlockSpec((ksc, n), lambda i: (0, 0)),
            pl.BlockSpec((2, n), lambda i: (0, 0)),
        ],
        out_specs=pl.BlockSpec((tm, n), lambda i: (i, 0)),
        out_shape=jax.ShapeDtypeStruct((m_pad, n), jnp.bfloat16),
        compiler_params=_PARALLEL,
    )(y2_2d, w3, sb3, xs2d, wsc, sbsc)
    return out[:m] if m_pad != m else out


def fused_conv3_identity(y2_2d, w3, sb3, res2d):
    """Final stage with identity shortcut: relu(conv3+bn3 + res), bf16 output."""
    m, kp = y2_2d.shape
    n = w3.shape[1]
    if res2d.shape[1] != n:
        res2d = jnp.pad(res2d, ((0, 0), (0, n - res2d.shape[1])))
    tm, grid, m_pad = _plan_m(m)
    if m_pad != m:
        y2_2d = jnp.pad(y2_2d, ((0, m_pad - m), (0, 0)))
        res2d = jnp.pad(res2d, ((0, m_pad - m), (0, 0)))
    out = pl.pallas_call(
        conv3_add_relu_kernel,
        grid=(grid,),
        in_specs=[
            pl.BlockSpec((tm, kp), lambda i: (i, 0)),
            pl.BlockSpec((kp, n), lambda i: (0, 0)),
            pl.BlockSpec((2, n), lambda i: (0, 0)),
            pl.BlockSpec((tm, n), lambda i: (i, 0)),
        ],
        out_specs=pl.BlockSpec((tm, n), lambda i: (i, 0)),
        out_shape=jax.ShapeDtypeStruct((m_pad, n), jnp.bfloat16),
        compiler_params=_PARALLEL,
    )(y2_2d, w3, sb3, res2d)
    return out[:m] if m_pad != m else out


# ------------------------------ parameter prep (one-time, outside hot path) ---
def prepare_params(params, *, stride):
    """Fold eval-mode BN to (scale, bias), zero-pad channels to lane width (128),
    reshape conv weights to matmul layout, cast weights to bf16."""
    cin = params['w1'].shape[2]
    planes = params['w1'].shape[3]
    cout = EXPANSION * planes
    cp = max(_round_up(planes, LANE), LANE)
    cop = max(_round_up(cout, LANE), LANE)

    def fold(bn, n_pad):
        scale = bn['gamma'] / jnp.sqrt(bn['var'] + BN_EPS)
        bias = bn['beta'] - bn['mean'] * scale
        sb = jnp.stack([scale, bias]).astype(jnp.float32)          # (2, C)
        return jnp.pad(sb, ((0, 0), (0, n_pad - sb.shape[1])))

    w1 = params['w1'].reshape(cin, planes)
    w1 = jnp.pad(w1, ((0, 0), (0, cp - planes))).astype(jnp.bfloat16)

    w2 = jnp.pad(params['w2'],                                     # (3,3,Ci,Co) HWIO
                 ((0, 0), (0, 0), (0, cp - planes), (0, cp - planes)))
    w2 = w2.reshape(9, cp, cp).astype(jnp.bfloat16)

    w3 = params['w3'].reshape(planes, cout)
    w3 = jnp.pad(w3, ((0, cp - planes), (0, cop - cout))).astype(jnp.bfloat16)

    prep = {
        'w1': w1, 'sb1': fold(params['bn1'], cp),
        'w2': w2, 'sb2': fold(params['bn2'], cp),
        'w3': w3, 'sb3': fold(params['bn3'], cop),
    }
    if stride != 1 or cin != cout:
        wsc = params['w_sc'].reshape(cin, cout)
        prep['w_sc'] = jnp.pad(wsc, ((0, 0), (0, cop - cout))).astype(jnp.bfloat16)
        prep['sb_sc'] = fold(params['bn_sc'], cop)
    return prep


# ------------------------------ forward ------------------------------
def bottleneck_forward(x_nchw, prep, *, stride, planes):
    b, cin, h, w = x_nchw.shape
    cout = EXPANSION * planes
    cp = prep['w1'].shape[1]

    # TODO(synk): keep the whole block NHWC end-to-end if the surrounding model
    # allows; the NCHW<->NHWC transposes here are pure layout glue.
    xh = jnp.transpose(x_nchw, (0, 2, 3, 1))                       # (B,H,W,Cin) f32

    # --- conv1 (1x1) + bn1 + relu: one tall matmul, bf16/lane-dense output ---
    y1 = fused_matmul_bn_relu(xh.reshape(b * h * w, cin), prep['w1'], prep['sb1'])
    y1 = y1.reshape(b, h, w, cp)

    # --- conv2 (3x3, stride, pad=1) + bn2 + relu: direct 9-tap conv in-kernel ---
    y2, ho, wo = fused_conv3x3_bn_relu(y1, prep['w2'], prep['sb2'], stride)
    y2 = y2.reshape(b * ho * wo, cp)

    # --- conv3 (1x1) + bn3 + shortcut + relu, all fused ---
    if 'w_sc' in prep:
        # TODO(synk): fold this strided spatial subsample into the kernel's
        # index_map; it is a small single XLA gather pass here.
        xs = xh[:, ::stride, ::stride, :].reshape(b * ho * wo, cin)
        out = fused_conv3_shortcut(y2, prep['w3'], prep['sb3'],
                                   xs, prep['w_sc'], prep['sb_sc'])
    else:
        res = xh.reshape(b * ho * wo, cin)
        out = fused_conv3_identity(y2, prep['w3'], prep['sb3'], res)

    out = out[:, :cout].reshape(b, ho, wo, cout)                   # drop lane padding
    out = jnp.transpose(out, (0, 3, 1, 2))                         # NCHW, still bf16
    return out.astype(jnp.float32)


# ------------------------------ reference (pure JAX, f32) ------------------------------
def ref_forward(x_nchw, params, *, stride, eps=BN_EPS):
    def bn(x, p):
        return (x - p['mean']) / jnp.sqrt(p['var'] + eps) * p['gamma'] + p['beta']

    def conv(x, w, s, pad):
        return jax.lax.conv_general_dilated(
            x, w, window_strides=(s, s), padding=((pad, pad), (pad, pad)),
            dimension_numbers=('NHWC', 'HWIO', 'NHWC'))

    x = jnp.transpose(x_nchw, (0, 2, 3, 1))
    cin = x.shape[-1]
    cout = params['w3'].shape[-1]

    out = jax.nn.relu(bn(conv(x, params['w1'], 1, 0), params['bn1']))
    out = jax.nn.relu(bn(conv(out, params['w2'], stride, 1), params['bn2']))
    out = bn(conv(out, params['w3'], 1, 0), params['bn3'])
    if stride != 1 or cin != cout:
        sc = bn(conv(x, params['w_sc'], stride, 0), params['bn_sc'])
    else:
        sc = x
    out = jax.nn.relu(out + sc)
    return jnp.transpose(out, (0, 3, 1, 2))


# ------------------------------ parameter init ------------------------------
def init_params(key, in_planes, planes):
    cout = EXPANSION * planes
    ks = iter(jax.random.split(key, 32))

    def conv_w(shape):                                             # HWIO layout
        fan_in = shape[0] * shape[1] * shape[2]
        return (jax.random.normal(next(ks), shape) / np.sqrt(fan_in)).astype(jnp.float32)

    def bn(n):
        return {
            'gamma': (1.0 + 0.1 * jax.random.normal(next(ks), (n,))).astype(jnp.float32),
            'beta': (0.1 * jax.random.normal(next(ks), (n,))).astype(jnp.float32),
            'mean': (0.1 * jax.random.normal(next(ks), (n,))).astype(jnp.float32),
            'var': jax.random.uniform(next(ks), (n,), minval=0.5, maxval=1.5).astype(jnp.float32),
        }

    return {
        'w1': conv_w((1, 1, in_planes, planes)), 'bn1': bn(planes),
        'w2': conv_w((3, 3, planes, planes)),    'bn2': bn(planes),
        'w3': conv_w((1, 1, planes, cout)),      'bn3': bn(cout),
        'w_sc': conv_w((1, 1, in_planes, cout)), 'bn_sc': bn(cout),
    }


# ------------------------------ main ------------------------------
if __name__ == "__main__":
    BATCH, IN_PLANES, PLANES, H, W, STRIDE = 2, 64, 32, 16, 16, 2
    COUT = EXPANSION * PLANES                                      # 128, lane-dense

    key = jax.random.PRNGKey(0)
    kx, kp = jax.random.split(key)
    x = jax.random.normal(kx, (BATCH, IN_PLANES, H, W), dtype=jnp.float32)
    params = init_params(kp, IN_PLANES, PLANES)

    prep = prepare_params(params, stride=STRIDE)                   # one-time fold/pad/cast
    fwd = jax.jit(functools.partial(bottleneck_forward, stride=STRIDE, planes=PLANES))
    out = jax.block_until_ready(fwd(x, prep))

    ref = jax.block_until_ready(ref_forward(x, params, stride=STRIDE))
    # bf16 matmul operands / bf16 inter-stage activations vs f32 reference
    np.testing.assert_allclose(np.asarray(out), np.asarray(ref), rtol=1e-1, atol=1e-1)

    assert out.shape == (BATCH, COUT, H // STRIDE, W // STRIDE)
    print("KERNEL_OK")
</pallas_src>

<mosaic_0001>
module attributes {stable_mosaic.version = 11 : i64} {
  func.func @conv1x1_bn_relu_kernel(%arg0: i32, %arg1: memref<256x64xf32, #tpu.memory_space<vmem>>, %arg2: memref<64x128xbf16, #tpu.memory_space<vmem>>, %arg3: memref<2x128xf32, #tpu.memory_space<vmem>>, %arg4: memref<256x128xbf16, #tpu.memory_space<vmem>>) attributes {dimension_semantics = [#tpu.dimension_semantics<parallel>], iteration_bounds = array<i64: 2>, scalar_prefetch = 0 : i64, scratch_operands = 0 : i64, tpu.core_type = #tpu.core_type<tc>, window_params = [{transform_indices = @transform_0, window_bounds = array<i64: 256, 64>}, {pipeline_mode = #tpu.pipeline_mode<synchronous>, transform_indices = @transform_1, window_bounds = array<i64: 64, 128>}, {pipeline_mode = #tpu.pipeline_mode<synchronous>, transform_indices = @transform_2, window_bounds = array<i64: 2, 128>}, {transform_indices = @transform_3, window_bounds = array<i64: 256, 128>}]} {
    %c0 = arith.constant 0 : index
    %c0_0 = arith.constant 0 : index
    %0 = vector.load %arg1[%c0, %c0_0] : memref<256x64xf32, #tpu.memory_space<vmem>>, vector<256x64xf32>
    %1 = arith.truncf %0 : vector<256x64xf32> to vector<256x64xbf16>
    %c0_1 = arith.constant 0 : index
    %c0_2 = arith.constant 0 : index
    %2 = vector.load %arg2[%c0_1, %c0_2] : memref<64x128xbf16, #tpu.memory_space<vmem>>, vector<64x128xbf16>
    %cst = arith.constant dense<0.000000e+00> : vector<256x128xf32>
    %3 = tpu.matmul %1, %2, %cst {dimension_numbers = #tpu.dot_dimension_numbers<[1], [0], [0], [1], [0, 0, 1, 1], [], []>} : vector<256x64xbf16>, vector<64x128xbf16>, vector<256x128xf32> -> vector<256x128xf32>
    %c0_3 = arith.constant 0 : index
    %c0_4 = arith.constant 0 : index
    %4 = vector.load %arg3[%c0_3, %c0_4] : memref<2x128xf32, #tpu.memory_space<vmem>>, vector<1x128xf32>
    %5 = vector.broadcast %4 : vector<1x128xf32> to vector<256x128xf32>
    %6 = arith.mulf %3, %5 : vector<256x128xf32>
    %c1 = arith.constant 1 : index
    %c0_5 = arith.constant 0 : index
    %7 = vector.load %arg3[%c1, %c0_5] : memref<2x128xf32, #tpu.memory_space<vmem>>, vector<1x128xf32>
    %8 = vector.broadcast %7 : vector<1x128xf32> to vector<256x128xf32>
    %9 = arith.addf %6, %8 : vector<256x128xf32>
    %cst_6 = arith.constant 0.000000e+00 : f32
    %10 = vector.broadcast %cst_6 : f32 to vector<256x128xf32>
    %11 = arith.maximumf %9, %10 : vector<256x128xf32>
    %12 = arith.truncf %11 : vector<256x128xf32> to vector<256x128xbf16>
    %c0_7 = arith.constant 0 : index
    %c0_8 = arith.constant 0 : index
    %13 = vector.load %arg4[%c0_7, %c0_8] : memref<256x128xbf16, #tpu.memory_space<vmem>>, vector<256x128xbf16>
    tpu.vector_store %arg4[%c0_7, %c0_8], %12 {strides = array<i32>} : memref<256x128xbf16, #tpu.memory_space<vmem>>, vector<256x128xbf16>,
    return
  }
  func.func @transform_0(%arg0: i32) -> (i32, i32) {
    %c0_i32 = arith.constant 0 : i32
    %c0_i32_0 = arith.constant 0 : i32
    return %arg0, %c0_i32 : i32, i32
  }
  func.func @transform_1(%arg0: i32) -> (i32, i32) {
    %c0_i32 = arith.constant 0 : i32
    %c0_i32_0 = arith.constant 0 : i32
    %c0_i32_1 = arith.constant 0 : i32
    return %c0_i32, %c0_i32_0 : i32, i32
  }
  func.func @transform_2(%arg0: i32) -> (i32, i32) {
    %c0_i32 = arith.constant 0 : i32
    %c0_i32_0 = arith.constant 0 : i32
    %c0_i32_1 = arith.constant 0 : i32
    return %c0_i32, %c0_i32_0 : i32, i32
  }
  func.func @transform_3(%arg0: i32) -> (i32, i32) {
    %c0_i32 = arith.constant 0 : i32
    %c0_i32_0 = arith.constant 0 : i32
    return %arg0, %c0_i32 : i32, i32
  }
}

module attributes {stable_mosaic.version = 11 : i64} {
  func.func @conv3x3_bn_relu_kernel(%arg0: i32, %arg1: memref<1x2x2x9x9x128xbf16, #tpu.memory_space<vmem>>, %arg2: memref<9x128x128xbf16, #tpu.memory_space<vmem>>, %arg3: memref<2x128xf32, #tpu.memory_space<vmem>>, %arg4: memref<1x8x8x128xbf16, #tpu.memory_space<vmem>>) attributes {dimension_semantics = [#tpu.dimension_semantics<parallel>], iteration_bounds = array<i64: 2>, scalar_prefetch = 0 : i64, scratch_operands = 0 : i64, tpu.core_type = #tpu.core_type<tc>, window_params = [{transform_indices = @transform_0, window_bounds = array<i64: 1, 2, 2, 9, 9, 128>}, {pipeline_mode = #tpu.pipeline_mode<synchronous>, transform_indices = @transform_1, window_bounds = array<i64: 9, 128, 128>}, {pipeline_mode = #tpu.pipeline_mode<synchronous>, transform_indices = @transform_2, window_bounds = array<i64: 2, 128>}, {transform_indices = @transform_3, window_bounds = array<i64: 1, 8, 8, 128>}]} {
    %cst = arith.constant 0.000000e+00 : f32
    %0 = vector.broadcast %cst : f32 to vector<64x128xf32>
    %c0 = arith.constant 0 : index
    %c0_0 = arith.constant 0 : index
    %c0_1 = arith.constant 0 : index
    %c0_2 = arith.constant 0 : index
    %c0_3 = arith.constant 0 : index
    %c0_4 = arith.constant 0 : index
    %1 = vector.load %arg1[%c0, %c0_0, %c0_1, %c0_2, %c0_3, %c0_4] : memref<1x2x2x9x9x128xbf16, #tpu.memory_space<vmem>>, vector<1x1x1x8x8x128xbf16>
    %2 = vector.shape_cast %1 : vector<1x1x1x8x8x128xbf16> to vector<8x8x128xbf16>
    %3 = vector.shape_cast %2 : vector<8x8x128xbf16> to vector<64x128xbf16>
    %c0_5 = arith.constant 0 : index
    %c0_6 = arith.constant 0 : index
    %c0_7 = arith.constant 0 : index
    %4 = vector.load %arg2[%c0_5, %c0_6, %c0_7] : memref<9x128x128xbf16, #tpu.memory_space<vmem>>, vector<1x128x128xbf16>
    %5 = vector.shape_cast %4 : vector<1x128x128xbf16> to vector<128x128xbf16>
    %cst_8 = arith.constant dense<0.000000e+00> : vector<64x128xf32>
    %6 = tpu.matmul %3, %5, %cst_8 {dimension_numbers = #tpu.dot_dimension_numbers<[1], [0], [0], [1], [0, 0, 1, 1], [], []>} : vector<64x128xbf16>, vector<128x128xbf16>, vector<64x128xf32> -> vector<64x128xf32>
    %7 = arith.addf %0, %6 : vector<64x128xf32>
    %c0_9 = arith.constant 0 : index
    %c0_10 = arith.constant 0 : index
    %c1 = arith.constant 1 : index
    %c0_11 = arith.constant 0 : index
    %c0_12 = arith.constant 0 : index
    %c0_13 = arith.constant 0 : index
    %8 = vector.load %arg1[%c0_9, %c0_10, %c1, %c0_11, %c0_12, %c0_13] : memref<1x2x2x9x9x128xbf16, #tpu.memory_space<vmem>>, vector<1x1x1x8x8x128xbf16>
    %9 = vector.shape_cast %8 : vector<1x1x1x8x8x128xbf16> to vector<8x8x128xbf16>
    %10 = vector.shape_cast %9 : vector<8x8x128xbf16> to vector<64x128xbf16>
    %c1_14 = arith.constant 1 : index
    %c0_15 = arith.constant 0 : index
    %c0_16 = arith.constant 0 : index
    %11 = vector.load %arg2[%c1_14, %c0_15, %c0_16] : memref<9x128x128xbf16, #tpu.memory_space<vmem>>, vector<1x128x128xbf16>
    %12 = vector.shape_cast %11 : vector<1x128x128xbf16> to vector<128x128xbf16>
    %cst_17 = arith.constant dense<0.000000e+00> : vector<64x128xf32>
    %13 = tpu.matmul %10, %12, %cst_17 {dimension_numbers = #tpu.dot_dimension_numbers<[1], [0], [0], [1], [0, 0, 1, 1], [], []>} : vector<64x128xbf16>, vector<128x128xbf16>, vector<64x128xf32> -> vector<64x128xf32>
    %14 = arith.addf %7, %13 : vector<64x128xf32>
    %c0_18 = arith.constant 0 : index
    %c0_19 = arith.constant 0 : index
    %c0_20 = arith.constant 0 : index
    %c0_21 = arith.constant 0 : index
    %c1_22 = arith.constant 1 : index
    %c0_23 = arith.constant 0 : index
    %15 = vector.load %arg1[%c0_18, %c0_19, %c0_20, %c0_21, %c1_22, %c0_23] : memref<1x2x2x9x9x128xbf16, #tpu.memory_space<vmem>>, vector<1x1x1x8x8x128xbf16>
    %16 = vector.shape_cast %15 : vector<1x1x1x8x8x128xbf16> to vector<8x8x128xbf16>
    %17 = vector.shape_cast %16 : vector<8x8x128xbf16> to vector<64x128xbf16>
    %c2 = arith.constant 2 : index
    %c0_24 = arith.constant 0 : index
    %c0_25 = arith.constant 0 : index
    %18 = vector.load %arg2[%c2, %c0_24, %c0_25] : memref<9x128x128xbf16, #tpu.memory_space<vmem>>, vector<1x128x128xbf16>
    %19 = vector.shape_cast %18 : vector<1x128x128xbf16> to vector<128x128xbf16>
    %cst_26 = arith.constant dense<0.000000e+00> : vector<64x128xf32>
    %20 = tpu.matmul %17, %19, %cst_26 {dimension_numbers = #tpu.dot_dimension_numbers<[1], [0], [0], [1], [0, 0, 1, 1], [], []>} : vector<64x128xbf16>, vector<128x128xbf16>, vector<64x128xf32> -> vector<64x128xf32>
    %21 = arith.addf %14, %20 : vector<64x128xf32>
    %c0_27 = arith.constant 0 : index
    %c1_28 = arith.constant 1 : index
    %c0_29 = arith.constant 0 : index
    %c0_30 = arith.constant 0 : index
    %c0_31 = arith.constant 0 : index
    %c0_32 = arith.constant 0 : index
    %22 = vector.load %arg1[%c0_27, %c1_28, %c0_29, %c0_30, %c0_31, %c0_32] : memref<1x2x2x9x9x128xbf16, #tpu.memory_space<vmem>>, vector<1x1x1x8x8x128xbf16>
    %23 = vector.shape_cast %22 : vector<1x1x1x8x8x128xbf16> to vector<8x8x128xbf16>
    %24 = vector.shape_cast %23 : vector<8x8x128xbf16> to vector<64x128xbf16>
    %c3 = arith.constant 3 : index
    %c0_33 = arith.constant 0 : index
    %c0_34 = arith.constant 0 : index
    %25 = vector.load %arg2[%c3, %c0_33, %c0_34] : memref<9x128x128xbf16, #tpu.memory_space<vmem>>, vector<1x128x128xbf16>
    %26 = vector.shape_cast %25 : vector<1x128x128xbf16> to vector<128x128xbf16>
    %cst_35 = arith.constant dense<0.000000e+00> : vector<64x128xf32>
    %27 = tpu.matmul %24, %26, %cst_35 {dimension_numbers = #tpu.dot_dimension_numbers<[1], [0], [0], [1], [0, 0, 1, 1], [], []>} : vector<64x128xbf16>, vector<128x128xbf16>, vector<64x128xf32> -> vector<64x128xf32>
    %28 = arith.addf %21, %27 : vector<64x128xf32>
    %c0_36 = arith.constant 0 : index
    %c1_37 = arith.constant 1 : index
    %c1_38 = arith.constant 1 : index
    %c0_39 = arith.constant 0 : index
    %c0_40 = arith.constant 0 : index
    %c0_41 = arith.constant 0 : index
    %29 = vector.load %arg1[%c0_36, %c1_37, %c1_38, %c0_39, %c0_40, %c0_41] : memref<1x2x2x9x9x128xbf16, #tpu.memory_space<vmem>>, vector<1x1x1x8x8x128xbf16>
    %30 = vector.shape_cast %29 : vector<1x1x1x8x8x128xbf16> to vector<8x8x128xbf16>
    %31 = vector.shape_cast %30 : vector<8x8x128xbf16> to vector<64x128xbf16>
    %c4 = arith.constant 4 : index
    %c0_42 = arith.constant 0 : index
    %c0_43 = arith.constant 0 : index
    %32 = vector.load %arg2[%c4, %c0_42, %c0_43] : memref<9x128x128xbf16, #tpu.memory_space<vmem>>, vector<1x128x128xbf16>
    %33 = vector.shape_cast %32 : vector<1x128x128xbf16> to vector<128x128xbf16>
    %cst_44 = arith.constant dense<0.000000e+00> : vector<64x128xf32>
    %34 = tpu.matmul %31, %33, %cst_44 {dimension_numbers = #tpu.dot_dimension_numbers<[1], [0], [0], [1], [0, 0, 1, 1], [], []>} : vector<64x128xbf16>, vector<128x128xbf16>, vector<64x128xf32> -> vector<64x128xf32>
    %35 = arith.addf %28, %34 : vector<64x128xf32>
    %c0_45 = arith.constant 0 : index
    %c1_46 = arith.constant 1 : index
    %c0_47 = arith.constant 0 : index
    %c0_48 = arith.constant 0 : index
    %c1_49 = arith.constant 1 : index
    %c0_50 = arith.constant 0 : index
    %36 = vector.load %arg1[%c0_45, %c1_46, %c0_47, %c0_48, %c1_49, %c0_50] : memref<1x2x2x9x9x128xbf16, #tpu.memory_space<vmem>>, vector<1x1x1x8x8x128xbf16>
    %37 = vector.shape_cast %36 : vector<1x1x1x8x8x128xbf16> to vector<8x8x128xbf16>
    %38 = vector.shape_cast %37 : vector<8x8x128xbf16> to vector<64x128xbf16>
    %c5 = arith.constant 5 : index
    %c0_51 = arith.constant 0 : index
    %c0_52 = arith.constant 0 : index
    %39 = vector.load %arg2[%c5, %c0_51, %c0_52] : memref<9x128x128xbf16, #tpu.memory_space<vmem>>, vector<1x128x128xbf16>
    %40 = vector.shape_cast %39 : vector<1x128x128xbf16> to vector<128x128xbf16>
    %cst_53 = arith.constant dense<0.000000e+00> : vector<64x128xf32>
    %41 = tpu.matmul %38, %40, %cst_53 {dimension_numbers = #tpu.dot_dimension_numbers<[1], [0], [0], [1], [0, 0, 1, 1], [], []>} : vector<64x128xbf16>, vector<128x128xbf16>, vector<64x128xf32> -> vector<64x128xf32>
    %42 = arith.addf %35, %41 : vector<64x128xf32>
    %c0_54 = arith.constant 0 : index
    %c0_55 = arith.constant 0 : index
    %c0_56 = arith.constant 0 : index
    %c1_57 = arith.constant 1 : index
    %c0_58 = arith.constant 0 : index
    %c0_59 = arith.constant 0 : index
    %43 = vector.load %arg1[%c0_54, %c0_55, %c0_56, %c1_57, %c0_58, %c0_59] : memref<1x2x2x9x9x128xbf16, #tpu.memory_space<vmem>>, vector<1x1x1x8x8x128xbf16>
    %44 = vector.shape_cast %43 : vector<1x1x1x8x8x128xbf16> to vector<8x8x128xbf16>
    %45 = vector.shape_cast %44 : vector<8x8x128xbf16> to vector<64x128xbf16>
    %c6 = arith.constant 6 : index
    %c0_60 = arith.constant 0 : index
    %c0_61 = arith.constant 0 : index
    %46 = vector.load %arg2[%c6, %c0_60, %c0_61] : memref<9x128x128xbf16, #tpu.memory_space<vmem>>, vector<1x128x128xbf16>
    %47 = vector.shape_cast %46 : vector<1x128x128xbf16> to vector<128x128xbf16>
    %cst_62 = arith.constant dense<0.000000e+00> : vector<64x128xf32>
    %48 = tpu.matmul %45, %47, %cst_62 {dimension_numbers = #tpu.dot_dimension_numbers<[1], [0], [0], [1], [0, 0, 1, 1], [], []>} : vector<64x128xbf16>, vector<128x128xbf16>, vector<64x128xf32> -> vector<64x128xf32>
    %49 = arith.addf %42, %48 : vector<64x128xf32>
    %c0_63 = arith.constant 0 : index
    %c0_64 = arith.constant 0 : index
    %c1_65 = arith.constant 1 : index
    %c1_66 = arith.constant 1 : index
    %c0_67 = arith.constant 0 : index
    %c0_68 = arith.constant 0 : index
    %50 = vector.load %arg1[%c0_63, %c0_64, %c1_65, %c1_66, %c0_67, %c0_68] : memref<1x2x2x9x9x128xbf16, #tpu.memory_space<vmem>>, vector<1x1x1x8x8x128xbf16>
    %51 = vector.shape_cast %50 : vector<1x1x1x8x8x128xbf16> to vector<8x8x128xbf16>
    %52 = vector.shape_cast %51 : vector<8x8x128xbf16> to vector<64x128xbf16>
    %c7 = arith.constant 7 : index
    %c0_69 = arith.constant 0 : index
    %c0_70 = arith.constant 0 : index
    %53 = vector.load %arg2[%c7, %c0_69, %c0_70] : memref<9x128x128xbf16, #tpu.memory_space<vmem>>, vector<1x128x128xbf16>
    %54 = vector.shape_cast %53 : vector<1x128x128xbf16> to vector<128x128xbf16>
    %cst_71 = arith.constant dense<0.000000e+00> : vector<64x128xf32>
    %55 = tpu.matmul %52, %54, %cst_71 {dimension_numbers = #tpu.dot_dimension_numbers<[1], [0], [0], [1], [0, 0, 1, 1], [], []>} : vector<64x128xbf16>, vector<128x128xbf16>, vector<64x128xf32> -> vector<64x128xf32>
    %56 = arith.addf %49, %55 : vector<64x128xf32>
    %c0_72 = arith.constant 0 : index
    %c0_73 = arith.constant 0 : index
    %c0_74 = arith.constant 0 : index
    %c1_75 = arith.constant 1 : index
    %c1_76 = arith.constant 1 : index
    %c0_77 = arith.constant 0 : index
    %57 = vector.load %arg1[%c0_72, %c0_73, %c0_74, %c1_75, %c1_76, %c0_77] : memref<1x2x2x9x9x128xbf16, #tpu.memory_space<vmem>>, vector<1x1x1x8x8x128xbf16>
    %58 = vector.shape_cast %57 : vector<1x1x1x8x8x128xbf16> to vector<8x8x128xbf16>
    %59 = vector.shape_cast %58 : vector<8x8x128xbf16> to vector<64x128xbf16>
    %c8 = arith.constant 8 : index
    %c0_78 = arith.constant 0 : index
    %c0_79 = arith.constant 0 : index
    %60 = vector.load %arg2[%c8, %c0_78, %c0_79] : memref<9x128x128xbf16, #tpu.memory_space<vmem>>, vector<1x128x128xbf16>
    %61 = vector.shape_cast %60 : vector<1x128x128xbf16> to vector<128x128xbf16>
    %cst_80 = arith.constant dense<0.000000e+00> : vector<64x128xf32>
    %62 = tpu.matmul %59, %61, %cst_80 {dimension_numbers = #tpu.dot_dimension_numbers<[1], [0], [0], [1], [0, 0, 1, 1], [], []>} : vector<64x128xbf16>, vector<128x128xbf16>, vector<64x128xf32> -> vector<64x128xf32>
    %63 = arith.addf %56, %62 : vector<64x128xf32>
    %c0_81 = arith.constant 0 : index
    %c0_82 = arith.constant 0 : index
    %64 = vector.load %arg3[%c0_81, %c0_82] : memref<2x128xf32, #tpu.memory_space<vmem>>, vector<1x128xf32>
    %65 = vector.broadcast %64 : vector<1x128xf32> to vector<64x128xf32>
    %66 = arith.mulf %63, %65 : vector<64x128xf32>
    %c1_83 = arith.constant 1 : index
    %c0_84 = arith.constant 0 : index
    %67 = vector.load %arg3[%c1_83, %c0_84] : memref<2x128xf32, #tpu.memory_space<vmem>>, vector<1x128xf32>
    %68 = vector.broadcast %67 : vector<1x128xf32> to vector<64x128xf32>
    %69 = arith.addf %66, %68 : vector<64x128xf32>
    %cst_85 = arith.constant 0.000000e+00 : f32
    %70 = vector.broadcast %cst_85 : f32 to vector<64x128xf32>
    %71 = arith.maximumf %69, %70 : vector<64x128xf32>
    %72 = vector.shape_cast %71 : vector<64x128xf32> to vector<1x8x8x128xf32>
    %73 = arith.truncf %72 : vector<1x8x8x128xf32> to vector<1x8x8x128xbf16>
    %c0_86 = arith.constant 0 : index
    %c0_87 = arith.constant 0 : index
    %c0_88 = arith.constant 0 : index
    %c0_89 = arith.constant 0 : index
    %74 = vector.load %arg4[%c0_86, %c0_87, %c0_88, %c0_89] : memref<1x8x8x128xbf16, #tpu.memory_space<vmem>>, vector<1x8x8x128xbf16>
    tpu.vector_store %arg4[%c0_86, %c0_87, %c0_88, %c0_89], %73 {strides = array<i32>} : memref<1x8x8x128xbf16, #tpu.memory_space<vmem>>, vector<1x8x8x128xbf16>,
    return
  }
  func.func @transform_0(%arg0: i32) -> (i32, i32, i32, i32, i32, i32) {
    %c0_i32 = arith.constant 0 : i32
    %c0_i32_0 = arith.constant 0 : i32
    %c0_i32_1 = arith.constant 0 : i32
    %c0_i32_2 = arith.constant 0 : i32
    %c0_i32_3 = arith.constant 0 : i32
    %c0_i32_4 = arith.constant 0 : i32
    return %arg0, %c0_i32, %c0_i32_0, %c0_i32_1, %c0_i32_2, %c0_i32_3 : i32, i32, i32, i32, i32, i32
  }
  func.func @transform_1(%arg0: i32) -> (i32, i32, i32) {
    %c0_i32 = arith.constant 0 : i32
    %c0_i32_0 = arith.constant 0 : i32
    %c0_i32_1 = arith.constant 0 : i32
    %c0_i32_2 = arith.constant 0 : i32
    return %c0_i32, %c0_i32_0, %c0_i32_1 : i32, i32, i32
  }
  func.func @transform_2(%arg0: i32) -> (i32, i32) {
    %c0_i32 = arith.constant 0 : i32
    %c0_i32_0 = arith.constant 0 : i32
    %c0_i32_1 = arith.constant 0 : i32
    return %c0_i32, %c0_i32_0 : i32, i32
  }
  func.func @transform_3(%arg0: i32) -> (i32, i32, i32, i32) {
    %c0_i32 = arith.constant 0 : i32
    %c0_i32_0 = arith.constant 0 : i32
    %c0_i32_1 = arith.constant 0 : i32
    %c0_i32_2 = arith.constant 0 : i32
    return %arg0, %c0_i32, %c0_i32_0, %c0_i32_1 : i32, i32, i32, i32
  }
}

module attributes {stable_mosaic.version = 11 : i64} {
  func.func @conv3_shortcut_add_relu_kernel(%arg0: i32, %arg1: memref<64x128xbf16, #tpu.memory_space<vmem>>, %arg2: memref<128x128xbf16, #tpu.memory_space<vmem>>, %arg3: memref<2x128xf32, #tpu.memory_space<vmem>>, %arg4: memref<64x64xf32, #tpu.memory_space<vmem>>, %arg5: memref<64x128xbf16, #tpu.memory_space<vmem>>, %arg6: memref<2x128xf32, #tpu.memory_space<vmem>>, %arg7: memref<64x128xbf16, #tpu.memory_space<vmem>>) attributes {dimension_semantics = [#tpu.dimension_semantics<parallel>], iteration_bounds = array<i64: 2>, scalar_prefetch = 0 : i64, scratch_operands = 0 : i64, tpu.core_type = #tpu.core_type<tc>, window_params = [{transform_indices = @transform_0, window_bounds = array<i64: 64, 128>}, {pipeline_mode = #tpu.pipeline_mode<synchronous>, transform_indices = @transform_1, window_bounds = array<i64: 128, 128>}, {pipeline_mode = #tpu.pipeline_mode<synchronous>, transform_indices = @transform_2, window_bounds = array<i64: 2, 128>}, {transform_indices = @transform_3, window_bounds = array<i64: 64, 64>}, {pipeline_mode = #tpu.pipeline_mode<synchronous>, transform_indices = @transform_4, window_bounds = array<i64: 64, 128>}, {pipeline_mode = #tpu.pipeline_mode<synchronous>, transform_indices = @transform_5, window_bounds = array<i64: 2, 128>}, {transform_indices = @transform_6, window_bounds = array<i64: 64, 128>}]} {
    %c0 = arith.constant 0 : index
    %c0_0 = arith.constant 0 : index
    %0 = vector.load %arg1[%c0, %c0_0] : memref<64x128xbf16, #tpu.memory_space<vmem>>, vector<64x128xbf16>
    %c0_1 = arith.constant 0 : index
    %c0_2 = arith.constant 0 : index
    %1 = vector.load %arg2[%c0_1, %c0_2] : memref<128x128xbf16, #tpu.memory_space<vmem>>, vector<128x128xbf16>
    %cst = arith.constant dense<0.000000e+00> : vector<64x128xf32>
    %2 = tpu.matmul %0, %1, %cst {dimension_numbers = #tpu.dot_dimension_numbers<[1], [0], [0], [1], [0, 0, 1, 1], [], []>} : vector<64x128xbf16>, vector<128x128xbf16>, vector<64x128xf32> -> vector<64x128xf32>
    %c0_3 = arith.constant 0 : index
    %c0_4 = arith.constant 0 : index
    %3 = vector.load %arg3[%c0_3, %c0_4] : memref<2x128xf32, #tpu.memory_space<vmem>>, vector<1x128xf32>
    %4 = vector.broadcast %3 : vector<1x128xf32> to vector<64x128xf32>
    %5 = arith.mulf %2, %4 : vector<64x128xf32>
    %c1 = arith.constant 1 : index
    %c0_5 = arith.constant 0 : index
    %6 = vector.load %arg3[%c1, %c0_5] : memref<2x128xf32, #tpu.memory_space<vmem>>, vector<1x128xf32>
    %7 = vector.broadcast %6 : vector<1x128xf32> to vector<64x128xf32>
    %8 = arith.addf %5, %7 : vector<64x128xf32>
    %c0_6 = arith.constant 0 : index
    %c0_7 = arith.constant 0 : index
    %9 = vector.load %arg4[%c0_6, %c0_7] : memref<64x64xf32, #tpu.memory_space<vmem>>, vector<64x64xf32>
    %10 = arith.truncf %9 : vector<64x64xf32> to vector<64x64xbf16>
    %c0_8 = arith.constant 0 : index
    %c0_9 = arith.constant 0 : index
    %11 = vector.load %arg5[%c0_8, %c0_9] : memref<64x128xbf16, #tpu.memory_space<vmem>>, vector<64x128xbf16>
    %cst_10 = arith.constant dense<0.000000e+00> : vector<64x128xf32>
    %12 = tpu.matmul %10, %11, %cst_10 {dimension_numbers = #tpu.dot_dimension_numbers<[1], [0], [0], [1], [0, 0, 1, 1], [], []>} : vector<64x64xbf16>, vector<64x128xbf16>, vector<64x128xf32> -> vector<64x128xf32>
    %c0_11 = arith.constant 0 : index
    %c0_12 = arith.constant 0 : index
    %13 = vector.load %arg6[%c0_11, %c0_12] : memref<2x128xf32, #tpu.memory_space<vmem>>, vector<1x128xf32>
    %14 = vector.broadcast %13 : vector<1x128xf32> to vector<64x128xf32>
    %15 = arith.mulf %12, %14 : vector<64x128xf32>
    %c1_13 = arith.constant 1 : index
    %c0_14 = arith.constant 0 : index
    %16 = vector.load %arg6[%c1_13, %c0_14] : memref<2x128xf32, #tpu.memory_space<vmem>>, vector<1x128xf32>
    %17 = vector.broadcast %16 : vector<1x128xf32> to vector<64x128xf32>
    %18 = arith.addf %15, %17 : vector<64x128xf32>
    %19 = arith.addf %8, %18 : vector<64x128xf32>
    %cst_15 = arith.constant 0.000000e+00 : f32
    %20 = vector.broadcast %cst_15 : f32 to vector<64x128xf32>
    %21 = arith.maximumf %19, %20 : vector<64x128xf32>
    %22 = arith.truncf %21 : vector<64x128xf32> to vector<64x128xbf16>
    %c0_16 = arith.constant 0 : index
    %c0_17 = arith.constant 0 : index
    %23 = vector.load %arg7[%c0_16, %c0_17] : memref<64x128xbf16, #tpu.memory_space<vmem>>, vector<64x128xbf16>
    tpu.vector_store %arg7[%c0_16, %c0_17], %22 {strides = array<i32>} : memref<64x128xbf16, #tpu.memory_space<vmem>>, vector<64x128xbf16>,
    return
  }
  func.func @transform_0(%arg0: i32) -> (i32, i32) {
    %c0_i32 = arith.constant 0 : i32
    %c0_i32_0 = arith.constant 0 : i32
    return %arg0, %c0_i32 : i32, i32
  }
  func.func @transform_1(%arg0: i32) -> (i32, i32) {
    %c0_i32 = arith.constant 0 : i32
    %c0_i32_0 = arith.constant 0 : i32
    %c0_i32_1 = arith.constant 0 : i32
    return %c0_i32, %c0_i32_0 : i32, i32
  }
  func.func @transform_2(%arg0: i32) -> (i32, i32) {
    %c0_i32 = arith.constant 0 : i32
    %c0_i32_0 = arith.constant 0 : i32
    %c0_i32_1 = arith.constant 0 : i32
    return %c0_i32, %c0_i32_0 : i32, i32
  }
  func.func @transform_3(%arg0: i32) -> (i32, i32) {
    %c0_i32 = arith.constant 0 : i32
    %c0_i32_0 = arith.constant 0 : i32
    return %arg0, %c0_i32 : i32, i32
  }
  func.func @transform_4(%arg0: i32) -> (i32, i32) {
    %c0_i32 = arith.constant 0 : i32
    %c0_i32_0 = arith.constant 0 : i32
    %c0_i32_1 = arith.constant 0 : i32
    return %c0_i32, %c0_i32_0 : i32, i32
  }
  func.func @transform_5(%arg0: i32) -> (i32, i32) {
    %c0_i32 = arith.constant 0 : i32
    %c0_i32_0 = arith.constant 0 : i32
    %c0_i32_1 = arith.constant 0 : i32
    return %c0_i32, %c0_i32_0 : i32, i32
  }
  func.func @transform_6(%arg0: i32) -> (i32, i32) {
    %c0_i32 = arith.constant 0 : i32
    %c0_i32_0 = arith.constant 0 : i32
    return %arg0, %c0_i32 : i32, i32
  }
}

</mosaic_0001>

<bundles_post_ra>
// kernel: bottleneck_forward.3
= control target key start
LH: loop header
LB: loop body
LE: loop exit
PB: predicated region body
PF: predicated region fallthrough
CT: control target
= control target key end

     0   :  { %8 = vsyncpa [#allocation3], 0  ;;  %s1260_s0 = inlined_call_operand.hbm [shape: f32[512,64], index: 0, kind: input, shape index: {}]   ;;  %s1261_s1 = inlined_call_operand.hbm [shape: bf16[64,128], index: 1, kind: input, shape index: {}]   ;;  %s1262_s2 = inlined_call_operand.vmem [shape: f32[2,128], index: 2, kind: input, shape index: {}]   ;;  %s1263_s3 = inlined_call_operand.vmem [shape: bf16[512,128], index: 3, kind: output, shape index: {}]  }
   0x1   :  { %10 = vsyncpa [#allocation3 + $0x1], 0 }
   0x2   :  { %11 = vsyncpa [#allocation5], 0  ;;  %s1012_s12 = smov 0   ;;  %s1014_s13 = smov 0  }
   0x3   :  { %s1016_s14 = smov 0   ;;  %s1018_s15 = smov 0  }
   0x4 LB: > { %s672_s16 = sadd.s32 4294967295, %s985_s15   ;;  %p37_p0 = scmp.ne.s32.totalorder %s977_s13, %s973_s12  ;;  %s985_s15 = sphi %s1018_s15, %s1271_s15   ;;  %s981_s14 = sphi %s1016_s14, %s1270_s14   ;;  %s977_s13 = sphi %s1014_s13, %s1269_s13   ;;  %s973_s12 = sphi %s1012_s12, %s1268_s12  }
   0x5   : > { %p1034_p1 = scmp.eq.s32.totalorder %s672_s16, 0  ;;  %p674_p2 = scmp.ge.s32.totalorder %s985_s15, 1 }
   0x6   : > { %p116_p3 = scmp.lt.s32.totalorder %s985_s15, 3  ;;  %s127_s21 = sshll.u32 %s1261_s1, 4  ;;  %s128_s21 = int_to_ptr.hbm [resolvable:$true] %s127_s21 }
   0x7   : > { %p1042_p4 = por %p1034_p1, %p37_p0  ;;  %s987_s23 = smov [#allocation4]  }
   0x8   : > { %p1049_p5 = pnand %p674_p2, %p116_p3  ;;  %s129_s24 = sshll.u32 %s987_s23, 4  ;;  %s130_s24 = int_to_ptr.vmem [resolvable:$true] %s129_s24 }
   0x9   : > { %s1058_s25 = sadd.s32 1, %s985_s15   ;;  %s988_s26 = smov 64  }
   0xa   : > { %p837_p6 = pneg %p1049_p5  ;;  %s989_s27 = smov 4  }
   0xb   : > { %s21_s28 = ssub.s32 %s985_s15, %s1058_s25  ;;  %s24_s29 = sadd.s32 1, %s981_s14 }
   0xc   : > { %p838_p7 = pnand %p837_p6, %p1034_p1  ;;  %p22_p8 = scmp.eq.s32.totalorder %s21_s28, 0 }
   0xd   : > { %p31_p9 = scmp.ne.s32.totalorder %s981_s14, %s977_s13  ;;  %p32_p10 = scmp.eq.s32.totalorder %s985_s15, 0 }
   0xe   : > { %840 = dma.hbm_to_vmem [thread:$0]  (!%p838_p7), %s128_s21, 512, %s130_s24, [#allocation5], %s988_s26, %s988_s26, %s989_s27  }
   0xf   : > { %p846_p11 = scmp.lt.s32.totalorder %s985_s15, 2  ;;  %p33_p12 = por %p32_p10, %p31_p9 }
  0x10   : > { %s1068_s30 = scalar_select %p22_p8, %s981_s14, %s24_s29  }
  0x11   : > { %s146_s4 = sand.u32 1, %s981_s14   ;;  %s719_s6 = sshll.u32 %s985_s15, 8 }
  0x12   : > { %s677_s5 = sshll.u32 %s146_s4, 8  ;;  %s155_s9 = scalar_lea.hbm %s1260_s0, %s719_s6 }
  0x13   : > { %s150_s10 = scalar_lea.vmem [#allocation2], %s677_s5  ;;  %s156_s12 = sshll.u32 %s155_s9, 4  ;;  %s157_s12 = int_to_ptr.hbm [resolvable:$true] %s156_s12 }
  0x14   : > { %s158_s11 = sshll.u32 %s150_s10, 4  ;;  %p1075_p13 = pnand %p846_p11, %p33_p12  ;;  %s159_s11 = int_to_ptr.vmem [resolvable:$true] %s158_s11 }
  0x15   : > { %s147_s20 = scalar_lea.sflag [#allocation3], %s146_s4  ;;  %s917_s21 = sshra.s32 %s157_s12, 4  ;;  %s918_s21 = int_to_ptr.hbm [resolvable:$true] %s917_s21 }
  0x16   : > { %s919_s23 = scalar_lea.hbm %s918_s21, 256  ;;  %p921_p2 = pneg %p1075_p13 }
  0x17   : > { %p920_p0 = scmp.ne.s32.totalorder %s918_s21, %s919_s23  ;;  %s924_s27 = scalar_lea.hbm %s1260_s0, 512 }
  0x18   : > { %p925_p7 = scmp.lt.s32.totalorder %s918_s21, %s1260_s0  ;;  %p926_p8 = scmp.lt.s32.totalorder %s924_s27, %s919_s23 }
  0x19   : > { %p922_p3 = pnand %p921_p2, %p920_p0 }
  0x1a   : > { %p927_p9 = por %p926_p8, %p925_p7 }
  0x1b   : > { %p923_p6 = pneg %p922_p3 }
  0x1d   : > { %p928_p10 = pnand %p927_p9, %p923_p6 }
  0x1f   : > { %931 = shalt.err (!%p928_p10)
}
  0x20   : > { %s990_s4 = smov 128   ;;  %s991_s5 = smov 8  }
  0x21   : > { %844 = dma.hbm_to_vmem [thread:$0]  (!%p1075_p13), %s157_s12, 4096, %s159_s11, %s147_s20, %s990_s4, %s990_s4, %s991_s5  }
  0x22   : > { %170 = sbr.rel (%p1049_p5) target bundleno = 257 (0x101), region = 32  ;;  %s172_s6 = sand.u32 (!%p1049_p5), 1, %s977_s13  }
  0x23   : > { %s681_s7 = sshll.u32 (!%p1049_p5), %s172_s6, 8  ;;  %s173_s8 = scalar_lea.sflag (!%p1049_p5), [#allocation3], %s172_s6 }
  0x24   : > { %s1092_s9 = scalar_lea.vmem (!%p1049_p5), [#allocation2], %s681_s7 }
  0x27   : > { %964 = dma.done.wait (%p1042_p4), %s173_s8, 4096  }
  0x28   : > { %966 = vsyncadd (%p1042_p4), %s173_s8, 4294963200 }
  0x29   : > { %968 = dma.done.wait (%p1034_p1), [#allocation5], 512  }
  0x2a   : > { %970 = vsyncadd (%p1034_p1), [#allocation5], 4294966784  ;;  %v723_v0 = vld [vmem:[#allocation4 + $0x18] sm:$0xff]  ;;  %v722_v1 = vld [vmem:[#allocation4 + $0x10] sm:$0xff]  ;;  %vm293_vm0 = vcmask 523264   ;;  %s683_s17 = sshll.u32 %s672_s16, 5 }
  0x2b   : > { %346 = vmatpush.bf16.msra.mxu0 %v723_v0  ;;  %819 = vmatpush.bf16.msra.mxu1 %v723_v0  ;;  %v721_v2 = vld [vmem:[#allocation4 + $0x8] sm:$0xff]  ;;  %v720_v3 = vld [vmem:[#allocation4] sm:$0xff]  ;;  %v215_v16 = vld [vmem:[%s1092_s9 + $0x10] sm:$0xff]  ;;  %p207_p1 = scmp.lt.s32.totalorder %s683_s17, 63 }
  0x2c   : > { %820 = vmatpush.bf16.msra.mxu2 %v723_v0  ;;  %821 = vmatpush.bf16.msra.mxu3 %v723_v0  ;;  %v213_v4 = vld [vmem:[%s1092_s9] sm:$0xff]  ;;  %v214_v5 = vld [vmem:[%s1092_s9 + $0x8] sm:$0xff]  ;;  %v216_v17 = vld [vmem:[%s1092_s9 + $0x18] sm:$0xff] }
  0x2d   : > { %v221_v6 = vld [vmem:[%s1092_s9 + $0x40] sm:$0xff]  ;;  %v222_v7 = vld [vmem:[%s1092_s9 + $0x48] sm:$0xff]  ;;  %v245_v12 = vpack.c.bf16 %v214_v5, %v213_v4  ;;  %v223_v18 = vld [vmem:[%s1092_s9 + $0x50] sm:$0xff]  ;;  %v246_v24 = vpack.c.bf16 %v216_v17, %v215_v16  ;;  %s1273_s17 = smov (!%p207_p1, %s683_s17), 63 }
  0x2e   : > { %v229_v8 = vld [vmem:[%s1092_s9 + $0x80] sm:$0xff]  ;;  %v230_v9 = vld [vmem:[%s1092_s9 + $0x88] sm:$0xff]  ;;  %v249_v13 = vpack.c.bf16 %v222_v7, %v221_v6  ;;  %v224_v19 = vld [vmem:[%s1092_s9 + $0x58] sm:$0xff]  ;;  %s684_s15 = sshll.u32 %s1273_s17, 2 }
  0x2f   : > { %347 = vmatpush.bf16.msra.mxu0 %v722_v1  ;;  %822 = vmatpush.bf16.msra.mxu1 %v722_v1  ;;  %v237_v10 = vld [vmem:[%s1092_s9 + $0xc0] sm:$0xff]  ;;  %v238_v11 = vld [vmem:[%s1092_s9 + $0xc8] sm:$0xff]  ;;  %v253_v14 = vpack.c.bf16 %v230_v9, %v229_v8  ;;  %v231_v20 = vld [vmem:[%s1092_s9 + $0x90] sm:$0xff]  ;;  %v250_v25 = vpack.c.bf16 %v224_v19, %v223_v18  ;;  %s1175_s19 = scalar_lea.vmem %s1263_s3, %s684_s15 }
  0x30   : > { %823 = vmatpush.bf16.msra.mxu2 %v722_v1  ;;  %824 = vmatpush.bf16.msra.mxu3 %v722_v1  ;;  %v257_v15 = vpack.c.bf16 %v238_v11, %v237_v10  ;;  %v232_v21 = vld [vmem:[%s1092_s9 + $0x98] sm:$0xff]  ;;  %v239_v22 = vld [vmem:[%s1092_s9 + $0xd0] sm:$0xff]  ;;  %v217_v28 = vld [vmem:[%s1092_s9 + $0x20] sm:$0xff] }
  0x31   : > { %v240_v23 = vld [vmem:[%s1092_s9 + $0xd8] sm:$0xff]  ;;  %v254_v26 = vpack.c.bf16 %v232_v21, %v231_v20  ;;  %v218_v29 = vld [vmem:[%s1092_s9 + $0x28] sm:$0xff]  ;;  %v225_v30 = vld [vmem:[%s1092_s9 + $0x60] sm:$0xff] }
  0x32   : > { %v258_v27 = vpack.c.bf16 %v240_v23, %v239_v22  ;;  %v226_v31 = vld [vmem:[%s1092_s9 + $0x68] sm:$0xff]  ;;  %v233_v32 = vld [vmem:[%s1092_s9 + $0xa0] sm:$0xff]  ;;  %v247_v36 = vpack.c.bf16 %v218_v29, %v217_v28  ;;  %v219_v40 = vld [vmem:[%s1092_s9 + $0x30] sm:$0xff] }
  0x33   : > { %348 = vmatpush.bf16.msra.mxu0 %v721_v2  ;;  %825 = vmatpush.bf16.msra.mxu1 %v721_v2  ;;  %v234_v33 = vld [vmem:[%s1092_s9 + $0xa8] sm:$0xff]  ;;  %v241_v34 = vld [vmem:[%s1092_s9 + $0xe0] sm:$0xff]  ;;  %v251_v37 = vpack.c.bf16 %v226_v31, %v225_v30  ;;  %v220_v41 = vld [vmem:[%s1092_s9 + $0x38] sm:$0xff] }
  0x34   : > { %826 = vmatpush.bf16.msra.mxu2 %v721_v2  ;;  %827 = vmatpush.bf16.msra.mxu3 %v721_v2  ;;  %v242_v35 = vld [vmem:[%s1092_s9 + $0xe8] sm:$0xff]  ;;  %v255_v38 = vpack.c.bf16 %v234_v33, %v233_v32  ;;  %v227_v42 = vld [vmem:[%s1092_s9 + $0x70] sm:$0xff]  ;;  %v228_v43 = vld [vmem:[%s1092_s9 + $0x78] sm:$0xff]  ;;  %v248_v48 = vpack.c.bf16 %v220_v41, %v219_v40 }
  0x35   : > { %v259_v39 = vpack.c.bf16 %v242_v35, %v241_v34  ;;  %v235_v44 = vld [vmem:[%s1092_s9 + $0xb0] sm:$0xff]  ;;  %v236_v45 = vld [vmem:[%s1092_s9 + $0xb8] sm:$0xff]  ;;  %v252_v49 = vpack.c.bf16 %v228_v43, %v227_v42  ;;  %v1155_v54 = vld [vmem:[%s1262_s2] ss:$0 sm:$0xff] }
  0x36   : > { %v243_v46 = vld [vmem:[%s1092_s9 + $0xf0] sm:$0xff]  ;;  %v244_v47 = vld [vmem:[%s1092_s9 + $0xf8] sm:$0xff]  ;;  %v256_v50 = vpack.c.bf16 %v236_v45, %v235_v44  ;;  %v1161_v56 = vld [vmem:[%s1262_s2 + $0x1] ss:$0 sm:$0xff] }
  0x37   : > { %349 = vmatpush.bf16.msra.mxu0 %v720_v3  ;;  %828 = vmatpush.bf16.msra.mxu1 %v720_v3  ;;  %v260_v51 = vpack.c.bf16 %v244_v47, %v243_v46 }
  0x38   : > { %829 = vmatpush.bf16.msra.mxu2 %v720_v3  ;;  %830 = vmatpush.bf16.msra.mxu3 %v720_v3 }
  0x3a   : > { %701 = vmatmul.msk.bf16.vlgmr.msra.gmra.mxu0 %vm293_vm0, %v245_v12  ;;  %705 = vmatmul.msk.bf16.vlgmr.msra.gmra.mxu1 %vm293_vm0, %v249_v13 }
  0x3b   : > { %709 = vmatmul.msk.bf16.vlgmr.msra.gmra.mxu2 %vm293_vm0, %v253_v14  ;;  %713 = vmatmul.msk.bf16.vlgmr.msra.gmra.mxu3 %vm293_vm0, %v257_v15 }
  0x4a   : > { %702 = vmatmul.msk.bf16.gmra.mxu0 %vm293_vm0, %v246_v24  ;;  %706 = vmatmul.msk.bf16.gmra.mxu1 %vm293_vm0, %v250_v25 }
  0x4b   : > { %710 = vmatmul.msk.bf16.gmra.mxu2 %vm293_vm0, %v254_v26  ;;  %714 = vmatmul.msk.bf16.gmra.mxu3 %vm293_vm0, %v258_v27 }
  0x5a   : > { %703 = vmatmul.msk.bf16.gmra.mxu0 %vm293_vm0, %v247_v36  ;;  %707 = vmatmul.msk.bf16.gmra.mxu1 %vm293_vm0, %v251_v37 }
  0x5b   : > { %711 = vmatmul.msk.bf16.gmra.mxu2 %vm293_vm0, %v255_v38  ;;  %715 = vmatmul.msk.bf16.gmra.mxu3 %vm293_vm0, %v259_v39 }
  0x6a   : > { %704 = vmatmul.msk.bf16.gmra.mxu0 %vm293_vm0, %v248_v48  ;;  %708 = vmatmul.msk.bf16.gmra.mxu1 %vm293_vm0, %v252_v49 }
  0x6b   : > { %712 = vmatmul.msk.bf16.gmra.mxu2 %vm293_vm0, %v256_v50  ;;  %716 = vmatmul.msk.bf16.gmra.mxu3 %vm293_vm0, %v260_v51 }
  0xb7   : > { %v351_v52 = vpop.f32.mrf.mxu0  ;;  %v371_v53 = vpop.f32.mrf.mxu1 }
  0xb8   : > { %v433_v55 = vmul.f32 %v1155_v54, %v351_v52  ;;  %v441_v57 = vmul.f32 %v1155_v54, %v371_v53 }
  0xba   : > { %v467_v62 = vadd.f32 %v1161_v56, %v433_v55  ;;  %v475_v63 = vadd.f32 %v1161_v56, %v441_v57 }
  0xbc   : > { %v499_v6 = vmax.f32 %v467_v62, 0.0  ;;  %v507_v7 = vmax.f32 %v475_v63, 0.0 }
  0xbe   : > { %v391_v58 = vpop.f32.mrf.mxu2  ;;  %v411_v59 = vpop.f32.mrf.mxu3 }
  0xbf   : > { %v353_v60 = vpop.f32.mrf.mxu0  ;;  %v373_v61 = vpop.f32.mrf.mxu1  ;;  %v449_v4 = vmul.f32 %v1155_v54, %v391_v58  ;;  %v457_v5 = vmul.f32 %v1155_v54, %v411_v59 }
  0xc0   : > { %v434_v0 = vmul.f32 %v1155_v54, %v353_v60  ;;  %v442_v1 = vmul.f32 %v1155_v54, %v373_v61 }
  0xc1   : > { %v483_v14 = vadd.f32 %v1161_v56, %v449_v4  ;;  %v491_v15 = vadd.f32 %v1161_v56, %v457_v5 }
  0xc2   : > { %v468_v2 = vadd.f32 %v1161_v56, %v434_v0  ;;  %v476_v3 = vadd.f32 %v1161_v56, %v442_v1 }
  0xc3   : > { %v515_v22 = vmax.f32 %v483_v14, 0.0  ;;  %v523_v23 = vmax.f32 %v491_v15, 0.0 }
  0xc4   : > { %v500_v8 = vmax.f32 %v468_v2, 0.0  ;;  %v508_v9 = vmax.f32 %v476_v3, 0.0 }
  0xc6   : > { %v727_v10 = vpack.c.bf16 %v500_v8, %v499_v6  ;;  %v747_v11 = vpack.c.bf16 %v508_v9, %v507_v7  ;;  %v393_v12 = vpop.f32.mrf.mxu2  ;;  %v413_v13 = vpop.f32.mrf.mxu3 }
  0xc7   : > { %v450_v16 = vmul.f32 %v1155_v54, %v393_v12  ;;  %v458_v17 = vmul.f32 %v1155_v54, %v413_v13  ;;  %v356_v18 = vpop.f32.mrf.mxu0  ;;  %v376_v19 = vpop.f32.mrf.mxu1 }
  0xc8   : > { %728 = vst [vmem:[%s1175_s19] sm:$0xff] %v727_v10   ;;  %v435_v26 = vmul.f32 %v1155_v54, %v356_v18  ;;  %v443_v27 = vmul.f32 %v1155_v54, %v376_v19 }
  0xc9   : > { %807 = vst [vmem:[%s1175_s19 + $0x20] sm:$0xff] %v747_v11   ;;  %v484_v20 = vadd.f32 %v1161_v56, %v450_v16  ;;  %v492_v21 = vadd.f32 %v1161_v56, %v458_v17 }
  0xca   : > { %v469_v34 = vadd.f32 %v1161_v56, %v435_v26  ;;  %v477_v35 = vadd.f32 %v1161_v56, %v443_v27 }
  0xcb   : > { %v516_v24 = vmax.f32 %v484_v20, 0.0  ;;  %v524_v25 = vmax.f32 %v492_v21, 0.0 }
  0xcc   : > { %v501_v42 = vmax.f32 %v469_v34, 0.0  ;;  %v509_v43 = vmax.f32 %v477_v35, 0.0 }
  0xcd   : > { %v767_v28 = vpack.c.bf16 %v516_v24, %v515_v22  ;;  %v787_v29 = vpack.c.bf16 %v524_v25, %v523_v23 }
  0xce   : > { %v396_v30 = vpop.f32.mrf.mxu2  ;;  %v416_v31 = vpop.f32.mrf.mxu3 }
  0xcf   : > { %811 = vst [vmem:[%s1175_s19 + $0x40] sm:$0xff] %v767_v28   ;;  %v358_v32 = vpop.f32.mrf.mxu0  ;;  %v378_v33 = vpop.f32.mrf.mxu1  ;;  %v451_v40 = vmul.f32 %v1155_v54, %v396_v30  ;;  %v459_v41 = vmul.f32 %v1155_v54, %v416_v31 }
  0xd0   : > { %815 = vst [vmem:[%s1175_s19 + $0x60] sm:$0xff] %v787_v29   ;;  %v436_v36 = vmul.f32 %v1155_v54, %v358_v32  ;;  %v444_v37 = vmul.f32 %v1155_v54, %v378_v33 }
  0xd1   : > { %v485_v50 = vadd.f32 %v1161_v56, %v451_v40  ;;  %v493_v51 = vadd.f32 %v1161_v56, %v459_v41 }
  0xd2   : > { %v470_v38 = vadd.f32 %v1161_v56, %v436_v36  ;;  %v478_v39 = vadd.f32 %v1161_v56, %v444_v37 }
  0xd3   : > { %v517_v60 = vmax.f32 %v485_v50, 0.0  ;;  %v525_v61 = vmax.f32 %v493_v51, 0.0 }
  0xd4   : > { %v502_v44 = vmax.f32 %v470_v38, 0.0  ;;  %v510_v45 = vmax.f32 %v478_v39, 0.0 }
  0xd6   : > { %v732_v46 = vpack.c.bf16 %v502_v44, %v501_v42  ;;  %v752_v47 = vpack.c.bf16 %v510_v45, %v509_v43  ;;  %v398_v48 = vpop.f32.mrf.mxu2  ;;  %v418_v49 = vpop.f32.mrf.mxu3 }
  0xd7   : > { %v452_v52 = vmul.f32 %v1155_v54, %v398_v48  ;;  %v460_v53 = vmul.f32 %v1155_v54, %v418_v49  ;;  %v361_v55 = vpop.f32.mrf.mxu0  ;;  %v381_v57 = vpop.f32.mrf.mxu1 }
  0xd8   : > { %804 = vst [vmem:[%s1175_s19 + $0x8] sm:$0xff] %v732_v46   ;;  %v437_v0 = vmul.f32 %v1155_v54, %v361_v55  ;;  %v445_v1 = vmul.f32 %v1155_v54, %v381_v57 }
  0xd9   : > { %808 = vst [vmem:[%s1175_s19 + $0x28] sm:$0xff] %v752_v47   ;;  %v486_v58 = vadd.f32 %v1161_v56, %v452_v52  ;;  %v494_v59 = vadd.f32 %v1161_v56, %v460_v53 }
  0xda   : > { %v471_v8 = vadd.f32 %v1161_v56, %v437_v0  ;;  %v479_v9 = vadd.f32 %v1161_v56, %v445_v1 }
  0xdb   : > { %v518_v62 = vmax.f32 %v486_v58, 0.0  ;;  %v526_v63 = vmax.f32 %v494_v59, 0.0 }
  0xdc   : > { %v503_v16 = vmax.f32 %v471_v8, 0.0  ;;  %v511_v17 = vmax.f32 %v479_v9, 0.0 }
  0xdd   : > { %v772_v2 = vpack.c.bf16 %v518_v62, %v517_v60  ;;  %v792_v3 = vpack.c.bf16 %v526_v63, %v525_v61 }
  0xde   : > { %v401_v4 = vpop.f32.mrf.mxu2  ;;  %v421_v5 = vpop.f32.mrf.mxu3 }
  0xdf   : > { %812 = vst [vmem:[%s1175_s19 + $0x48] sm:$0xff] %v772_v2   ;;  %v363_v6 = vpop.f32.mrf.mxu0  ;;  %v383_v7 = vpop.f32.mrf.mxu1  ;;  %v453_v14 = vmul.f32 %v1155_v54, %v401_v4  ;;  %v461_v15 = vmul.f32 %v1155_v54, %v421_v5 }
  0xe0   : > { %816 = vst [vmem:[%s1175_s19 + $0x68] sm:$0xff] %v792_v3   ;;  %v438_v10 = vmul.f32 %v1155_v54, %v363_v6  ;;  %v446_v11 = vmul.f32 %v1155_v54, %v383_v7 }
  0xe1   : > { %v487_v24 = vadd.f32 %v1161_v56, %v453_v14  ;;  %v495_v25 = vadd.f32 %v1161_v56, %v461_v15 }
  0xe2   : > { %v472_v12 = vadd.f32 %v1161_v56, %v438_v10  ;;  %v480_v13 = vadd.f32 %v1161_v56, %v446_v11 }
  0xe3   : > { %v519_v32 = vmax.f32 %v487_v24, 0.0  ;;  %v527_v33 = vmax.f32 %v495_v25, 0.0 }
  0xe4   : > { %v504_v18 = vmax.f32 %v472_v12, 0.0  ;;  %v512_v19 = vmax.f32 %v480_v13, 0.0 }
  0xe6   : > { %v737_v20 = vpack.c.bf16 %v504_v18, %v503_v16  ;;  %v757_v21 = vpack.c.bf16 %v512_v19, %v511_v17  ;;  %v403_v22 = vpop.f32.mrf.mxu2  ;;  %v423_v23 = vpop.f32.mrf.mxu3 }
  0xe7   : > { %v454_v26 = vmul.f32 %v1155_v54, %v403_v22  ;;  %v462_v27 = vmul.f32 %v1155_v54, %v423_v23  ;;  %v366_v28 = vpop.f32.mrf.mxu0  ;;  %v386_v29 = vpop.f32.mrf.mxu1 }
  0xe8   : > { %805 = vst [vmem:[%s1175_s19 + $0x10] sm:$0xff] %v737_v20   ;;  %v439_v36 = vmul.f32 %v1155_v54, %v366_v28  ;;  %v447_v37 = vmul.f32 %v1155_v54, %v386_v29 }
  0xe9   : > { %809 = vst [vmem:[%s1175_s19 + $0x30] sm:$0xff] %v757_v21   ;;  %v488_v30 = vadd.f32 %v1161_v56, %v454_v26  ;;  %v496_v31 = vadd.f32 %v1161_v56, %v462_v27 }
  0xea   : > { %v473_v44 = vadd.f32 %v1161_v56, %v439_v36  ;;  %v481_v45 = vadd.f32 %v1161_v56, %v447_v37 }
  0xeb   : > { %v520_v34 = vmax.f32 %v488_v30, 0.0  ;;  %v528_v35 = vmax.f32 %v496_v31, 0.0 }
  0xec   : > { %v505_v52 = vmax.f32 %v473_v44, 0.0  ;;  %v513_v53 = vmax.f32 %v481_v45, 0.0 }
  0xed   : > { %v777_v38 = vpack.c.bf16 %v520_v34, %v519_v32  ;;  %v797_v39 = vpack.c.bf16 %v528_v35, %v527_v33 }
  0xee   : > { %v406_v40 = vpop.f32.mrf.mxu2  ;;  %v426_v41 = vpop.f32.mrf.mxu3 }
  0xef   : > { %813 = vst [vmem:[%s1175_s19 + $0x50] sm:$0xff] %v777_v38   ;;  %v368_v42 = vpop.f32.mrf.mxu0  ;;  %v388_v43 = vpop.f32.mrf.mxu1  ;;  %v455_v50 = vmul.f32 %v1155_v54, %v406_v40  ;;  %v463_v51 = vmul.f32 %v1155_v54, %v426_v41 }
  0xf0   : > { %817 = vst [vmem:[%s1175_s19 + $0x70] sm:$0xff] %v797_v39   ;;  %v440_v46 = vmul.f32 %v1155_v54, %v368_v42  ;;  %v448_v47 = vmul.f32 %v1155_v54, %v388_v43 }
  0xf1   : > { %v489_v62 = vadd.f32 %v1161_v56, %v455_v50  ;;  %v497_v63 = vadd.f32 %v1161_v56, %v463_v51 }
  0xf2   : > { %v474_v48 = vadd.f32 %v1161_v56, %v440_v46  ;;  %v482_v49 = vadd.f32 %v1161_v56, %v448_v47 }
  0xf3   : > { %v521_v4 = vmax.f32 %v489_v62, 0.0  ;;  %v529_v5 = vmax.f32 %v497_v63, 0.0 }
  0xf4   : > { %v506_v55 = vmax.f32 %v474_v48, 0.0  ;;  %v514_v57 = vmax.f32 %v482_v49, 0.0 }
  0xf6   : > { %v742_v58 = vpack.c.bf16 %v506_v55, %v505_v52  ;;  %v762_v59 = vpack.c.bf16 %v514_v57, %v513_v53  ;;  %v408_v60 = vpop.f32.mrf.mxu2  ;;  %v428_v61 = vpop.f32.mrf.mxu3 }
  0xf7   : > { %v456_v0 = vmul.f32 %v1155_v54, %v408_v60  ;;  %v464_v1 = vmul.f32 %v1155_v54, %v428_v61 }
  0xf8   : > { %806 = vst [vmem:[%s1175_s19 + $0x18] sm:$0xff] %v742_v58  }
  0xf9   : > { %810 = vst [vmem:[%s1175_s19 + $0x38] sm:$0xff] %v762_v59   ;;  %v490_v2 = vadd.f32 %v1161_v56, %v456_v0  ;;  %v498_v3 = vadd.f32 %v1161_v56, %v464_v1 }
  0xfb   : > { %v522_v6 = vmax.f32 %v490_v2, 0.0  ;;  %v530_v7 = vmax.f32 %v498_v3, 0.0 }
  0xfd   : > { %v782_v8 = vpack.c.bf16 %v522_v6, %v521_v4  ;;  %v802_v9 = vpack.c.bf16 %v530_v7, %v529_v5 }
  0xff   : > { %814 = vst [vmem:[%s1175_s19 + $0x58] sm:$0xff] %v782_v8  }
 0x100   : > { %818 = vst [vmem:[%s1175_s19 + $0x78] sm:$0xff] %v802_v9  }
 0x101 PF: > { %p14_p4 = scmp.ge.s32.totalorder %s1058_s25, 4   ;;  %s1268_s12 = smov %s977_s13 }
 0x102   : > { %s1269_s13 = smov %s981_s14  ;;  %s1270_s14 = smov %s1068_s30 }
 0x103   : > { %s1271_s15 = smov %s1058_s25  ;;  %16 = sbr.rel (!%p14_p4) target bundleno = 4 (0x4), region = 76 }
 0x108   :  { %617 = vsyncpa [#allocation3], 1 }
 0x109   :  { %619 = vsyncpa [#allocation3 + $0x1], 1 }
 0x10a   :  { %620 = vsyncpa [#allocation5], 1 }

// kernel: bottleneck_forward.5
= control target key start
LH: loop header
LB: loop body
LE: loop exit
PB: predicated region body
PF: predicated region fallthrough
CT: control target
= control target key end

     0   :  { %s816_s21 = smov 0   ;;  %s912_s0 = inlined_call_operand.vmem [shape: bf16[128,128], index: 0, kind: input, shape index: {}]   ;;  %s913_s1 = inlined_call_operand.vmem [shape: bf16[128,128], index: 1, kind: input, shape index: {}]   ;;  %s914_s2 = inlined_call_operand.vmem [shape: f32[2,128], index: 2, kind: input, shape index: {}]   ;;  %s915_s3 = inlined_call_operand.vmem [shape: f32[128,64], index: 3, kind: input, shape index: {}]   ;;  %s916_s4 = inlined_call_operand.vmem [shape: bf16[64,128], index: 4, kind: input, shape index: {}]   ;;  %s917_s5 = inlined_call_operand.vmem [shape: f32[2,128], index: 5, kind: input, shape index: {}]   ;;  %s918_s6 = inlined_call_operand.vmem [shape: bf16[128,128], index: 6, kind: output, shape index: {}]  }
   0x1 LB: > { %s629_s22 = sadd.s32 4294967295, %s779_s21   ;;  %p633_p0 = scmp.ge.s32.totalorder %s779_s21, 1  ;;  %s779_s21 = sphi %s816_s21, %s16_s21  }
   0x2   : > { %p224_p1 = scmp.lt.s32.totalorder %s779_s21, 3 }
   0x4   : > { %p225_p2 = pnand %p633_p0, %p224_p1 }
   0x5   : > { %s634_s27 = sshll.u32 (!%p225_p2), %s629_s22, 3 }
   0x6   : > { %228 = sbr.rel (%p225_p2) target bundleno = 211 (0xd3), region = 44  ;;  %p260_p3 = scmp.lt.s32.totalorder (!%p225_p2), %s634_s27, 15 }
   0xb   : > { %v721_v0 = vld [vmem:[%s913_s1 + $0x38] sm:$0xff]  ;;  %v720_v2 = vld [vmem:[%s913_s1 + $0x30] sm:$0xff]  ;;  %s920_s27 = smov (!%p260_p3, %s634_s27), 15  ;;  %v719_v4 = vld [vmem:[%s913_s1 + $0x28] sm:$0xff]  ;;  %vm467_vm0 = vcmask 523264  }
   0xc   : > { %v725_v1 = vld [vmem:[%s916_s4 + $0x18] sm:$0xff]  ;;  %374 = vmatpush.bf16.msra.mxu0 %v721_v0  ;;  %749 = vmatpush.bf16.msra.mxu2 %v721_v0  ;;  %v724_v3 = vld [vmem:[%s916_s4 + $0x10] sm:$0xff]  ;;  %s637_s8 = sshll.u32 %s920_s27, 3  ;;  %v723_v5 = vld [vmem:[%s916_s4 + $0x8] sm:$0xff]  ;;  %s635_s28 = sshll.u32 %s920_s27, 2 }
   0xd   : > { %757 = vmatpush.bf16.msra.mxu3 %v725_v1  ;;  %484 = vmatpush.bf16.msra.mxu1 %v725_v1  ;;  %s848_s15 = scalar_lea.vmem %s915_s3, %s637_s8  ;;  %v718_v6 = vld [vmem:[%s913_s1 + $0x20] sm:$0xff]  ;;  %v717_v13 = vld [vmem:[%s913_s1 + $0x18] sm:$0xff]  ;;  %v716_v15 = vld [vmem:[%s913_s1 + $0x10] sm:$0xff]  ;;  %s263_s9 = scalar_lea.vmem %s912_s0, %s635_s28 }
   0xe   : > { %v722_v7 = vld [vmem:[%s916_s4] sm:$0xff]  ;;  %v425_v8 = vld [vmem:[%s848_s15 + $0x10] sm:$0xff]  ;;  %v426_v9 = vld [vmem:[%s848_s15 + $0x18] sm:$0xff]  ;;  %s903_s20 = scalar_lea.vmem %s918_s6, %s635_s28 }
   0xf   : > { %v423_v10 = vld [vmem:[%s848_s15] sm:$0xff]  ;;  %v424_v11 = vld [vmem:[%s848_s15 + $0x8] sm:$0xff]  ;;  %v432_v12 = vpack.c.bf16 %v426_v9, %v425_v8  ;;  %v712_v21 = vld [vmem:[%s263_s9 + $0x10] sm:$0xff] }
  0x10   : > { %375 = vmatpush.bf16.msra.mxu0 %v720_v2  ;;  %750 = vmatpush.bf16.msra.mxu2 %v720_v2  ;;  %v431_v14 = vpack.c.bf16 %v424_v11, %v423_v10  ;;  %v715_v16 = vld [vmem:[%s913_s1 + $0x8] sm:$0xff]  ;;  %v714_v17 = vld [vmem:[%s913_s1] sm:$0xff]  ;;  %v429_v23 = vld [vmem:[%s848_s15 + $0x30] sm:$0xff] }
  0x11   : > { %758 = vmatpush.bf16.msra.mxu3 %v724_v3  ;;  %485 = vmatpush.bf16.msra.mxu1 %v724_v3  ;;  %v427_v18 = vld [vmem:[%s848_s15 + $0x20] sm:$0xff]  ;;  %v428_v19 = vld [vmem:[%s848_s15 + $0x28] sm:$0xff]  ;;  %v430_v24 = vld [vmem:[%s848_s15 + $0x38] sm:$0xff] }
  0x12   : > { %v710_v20 = vld [vmem:[%s263_s9] sm:$0xff]  ;;  %v433_v22 = vpack.c.bf16 %v428_v19, %v427_v18  ;;  %v711_v25 = vld [vmem:[%s263_s9 + $0x8] sm:$0xff]  ;;  %v713_v26 = vld [vmem:[%s263_s9 + $0x18] sm:$0xff]  ;;  %v434_v27 = vpack.c.bf16 %v430_v24, %v429_v23 }
  0x13   : > { %v771_v31 = vld [vmem:[%s914_s2] ss:$0 sm:$0xff]  ;;  %v772_v36 = vld [vmem:[%s914_s2 + $0x1] ss:$0 sm:$0xff] }
  0x14   : > { %376 = vmatpush.bf16.msra.mxu0 %v719_v4  ;;  %751 = vmatpush.bf16.msra.mxu2 %v719_v4  ;;  %v769_v33 = vld [vmem:[%s917_s5] ss:$0 sm:$0xff]  ;;  %v770_v38 = vld [vmem:[%s917_s5 + $0x1] ss:$0 sm:$0xff] }
  0x15   : > { %759 = vmatpush.bf16.msra.mxu3 %v723_v5  ;;  %486 = vmatpush.bf16.msra.mxu1 %v723_v5 }
  0x18   : > { %377 = vmatpush.bf16.msra.mxu0 %v718_v6  ;;  %752 = vmatpush.bf16.msra.mxu2 %v718_v6 }
  0x19   : > { %760 = vmatpush.bf16.msra.mxu3 %v722_v7  ;;  %487 = vmatpush.bf16.msra.mxu1 %v722_v7 }
  0x1c   : > { %705 = vmatmul.msk.bf16.vlgmr.msra.gmra.mxu3 %vm467_vm0, %v432_v12  ;;  %378 = vmatpush.bf16.msra.mxu0 %v717_v13 }
  0x1d   : > { %753 = vmatpush.bf16.msra.mxu2 %v717_v13  ;;  %704 = vmatmul.msk.bf16.vlgmr.msra.gmra.mxu1 %vm467_vm0, %v431_v14 }
  0x20   : > { %379 = vmatpush.bf16.msra.mxu0 %v716_v15 }
  0x21   : > { %754 = vmatpush.bf16.msra.mxu2 %v716_v15 }
  0x24   : > { %380 = vmatpush.bf16.msra.mxu0 %v715_v16 }
  0x25   : > { %755 = vmatpush.bf16.msra.mxu2 %v715_v16 }
  0x28   : > { %381 = vmatpush.bf16.msra.mxu0 %v714_v17 }
  0x29   : > { %756 = vmatpush.bf16.msra.mxu2 %v714_v17 }
  0x2b   : > { %382 = vmatmul.bf16.vlgmr.msra.gmra.mxu0 %v710_v20 }
  0x2c   : > { %392 = vmatmul.bf16.vlgmr.msra.gmra.mxu2 %v712_v21  ;;  %706 = vmatmul.msk.bf16.gmra.mxu3 %vm467_vm0, %v433_v22 }
  0x3b   : > { %387 = vmatmul.bf16.gmra.mxu0 %v711_v25 }
  0x3c   : > { %397 = vmatmul.bf16.gmra.mxu2 %v713_v26  ;;  %707 = vmatmul.msk.bf16.gmra.mxu3 %vm467_vm0, %v434_v27 }
  0x9a   : > { %v489_v29 = vpop.f32.mrf.mxu1 }
  0x9b   : > { %v511_v37 = vmul.f32 %v769_v33, %v489_v29 }
  0x9d   : > { %v521_v41 = vadd.f32 %v770_v38, %v511_v37 }
  0x9f   : > { %v494_v28 = vpop.f32.mrf.mxu3 }
  0xa0   : > { %v513_v3 = vmul.f32 %v769_v33, %v494_v28 }
  0xa2   : > { %v491_v34 = vpop.f32.mrf.mxu1  ;;  %v523_v12 = vadd.f32 %v770_v38, %v513_v3 }
  0xa3   : > { %v512_v39 = vmul.f32 %v769_v33, %v491_v34 }
  0xa5   : > { %v522_v46 = vadd.f32 %v770_v38, %v512_v39 }
  0xa7   : > { %v496_v30 = vpop.f32.mrf.mxu3 }
  0xa8   : > { %v383_v32 = vpop.f32.mrf.mxu0  ;;  %v514_v6 = vmul.f32 %v769_v33, %v496_v30 }
  0xa9   : > { %v405_v35 = vmul.f32 %v771_v31, %v383_v32 }
  0xaa   : > { %v524_v16 = vadd.f32 %v770_v38, %v514_v6 }
  0xab   : > { %v415_v40 = vadd.f32 %v772_v36, %v405_v35 }
  0xad   : > { %v529_v49 = vadd.f32 %v521_v41, %v415_v40 }
  0xaf   : > { %v393_v42 = vpop.f32.mrf.mxu2  ;;  %v499_v43 = vpop.f32.mrf.mxu3  ;;  %v537_v54 = vmax.f32 %v529_v49, 0.0 }
  0xb0   : > { %v385_v44 = vpop.f32.mrf.mxu0  ;;  %v409_v47 = vmul.f32 %v771_v31, %v393_v42  ;;  %v515_v48 = vmul.f32 %v769_v33, %v499_v43 }
  0xb1   : > { %v406_v45 = vmul.f32 %v771_v31, %v385_v44 }
  0xb2   : > { %v419_v52 = vadd.f32 %v772_v36, %v409_v47  ;;  %v525_v53 = vadd.f32 %v770_v38, %v515_v48 }
  0xb3   : > { %v416_v50 = vadd.f32 %v772_v36, %v406_v45 }
  0xb4   : > { %v533_v62 = vadd.f32 %v525_v53, %v419_v52 }
  0xb5   : > { %v530_v51 = vadd.f32 %v522_v46, %v416_v50 }
  0xb6   : > { %v541_v4 = vmax.f32 %v533_v62, 0.0 }
  0xb7   : > { %v538_v55 = vmax.f32 %v530_v51, 0.0  ;;  %v395_v56 = vpop.f32.mrf.mxu2  ;;  %v501_v57 = vpop.f32.mrf.mxu3 }
  0xb8   : > { %v410_v58 = vmul.f32 %v771_v31, %v395_v56  ;;  %v516_v59 = vmul.f32 %v769_v33, %v501_v57  ;;  %v388_v60 = vpop.f32.mrf.mxu0 }
  0xb9   : > { %v729_v61 = vpack.c.bf16 %v538_v55, %v537_v54  ;;  %v407_v1 = vmul.f32 %v771_v31, %v388_v60 }
  0xba   : > { %v420_v63 = vadd.f32 %v772_v36, %v410_v58  ;;  %v526_v0 = vadd.f32 %v770_v38, %v516_v59 }
  0xbb   : > { %730 = vst [vmem:[%s903_s20] sm:$0xff] %v729_v61   ;;  %v417_v7 = vadd.f32 %v772_v36, %v407_v1 }
  0xbc   : > { %v534_v2 = vadd.f32 %v526_v0, %v420_v63 }
  0xbd   : > { %v531_v17 = vadd.f32 %v523_v12, %v417_v7 }
  0xbe   : > { %v542_v5 = vmax.f32 %v534_v2, 0.0 }
  0xbf   : > { %v398_v8 = vpop.f32.mrf.mxu2  ;;  %v504_v9 = vpop.f32.mrf.mxu3  ;;  %v539_v22 = vmax.f32 %v531_v17, 0.0 }
  0xc0   : > { %v739_v10 = vpack.c.bf16 %v542_v5, %v541_v4  ;;  %v390_v11 = vpop.f32.mrf.mxu0  ;;  %v411_v14 = vmul.f32 %v771_v31, %v398_v8  ;;  %v517_v15 = vmul.f32 %v769_v33, %v504_v9 }
  0xc1   : > { %v408_v13 = vmul.f32 %v771_v31, %v390_v11 }
  0xc2   : > { %747 = vst [vmem:[%s903_s20 + $0x10] sm:$0xff] %v739_v10   ;;  %v421_v20 = vadd.f32 %v772_v36, %v411_v14  ;;  %v527_v21 = vadd.f32 %v770_v38, %v517_v15 }
  0xc3   : > { %v418_v18 = vadd.f32 %v772_v36, %v408_v13 }
  0xc4   : > { %v535_v29 = vadd.f32 %v527_v21, %v421_v20 }
  0xc5   : > { %v532_v19 = vadd.f32 %v524_v16, %v418_v18 }
  0xc6   : > { %v543_v35 = vmax.f32 %v535_v29, 0.0 }
  0xc7   : > { %v540_v23 = vmax.f32 %v532_v19, 0.0  ;;  %v400_v24 = vpop.f32.mrf.mxu2  ;;  %v506_v25 = vpop.f32.mrf.mxu3 }
  0xc8   : > { %v412_v26 = vmul.f32 %v771_v31, %v400_v24  ;;  %v518_v27 = vmul.f32 %v769_v33, %v506_v25 }
  0xc9   : > { %v734_v28 = vpack.c.bf16 %v540_v23, %v539_v22 }
  0xca   : > { %v422_v30 = vadd.f32 %v772_v36, %v412_v26  ;;  %v528_v32 = vadd.f32 %v770_v38, %v518_v27 }
  0xcb   : > { %746 = vst [vmem:[%s903_s20 + $0x8] sm:$0xff] %v734_v28  }
  0xcc   : > { %v536_v34 = vadd.f32 %v528_v32, %v422_v30 }
  0xce   : > { %v544_v37 = vmax.f32 %v536_v34, 0.0 }
  0xd0   : > { %v744_v39 = vpack.c.bf16 %v544_v37, %v543_v35 }
  0xd2   : > { %748 = vst [vmem:[%s903_s20 + $0x18] sm:$0xff] %v744_v39  }
  0xd3 PF: > { %s16_s21 = sadd.s32 1, %s779_s21  }
  0xd4   : > { %p13_p4 = scmp.ge.s32.totalorder %s16_s21, 4  }
  0xd6   :  { %15 = sbr.rel (!%p13_p4) target bundleno = 1 (0x1), region = 77 }

// kernel: bottleneck_forward.4
= control target key start
LH: loop header
LB: loop body
LE: loop exit
PB: predicated region body
PF: predicated region fallthrough
CT: control target
= control target key end

     0   :  { %s2572_s12 = smov 0   ;;  %s3024_s0 = inlined_call_operand.vmem [shape: bf16[2,2,2,9,9,128], index: 0, kind: input, shape index: {}]   ;;  %s3025_s1 = inlined_call_operand.vmem [shape: bf16[9,128,128], index: 1, kind: input, shape index: {}]   ;;  %s3026_s2 = inlined_call_operand.vmem [shape: f32[2,128], index: 2, kind: input, shape index: {}]   ;;  %s3027_s3 = inlined_call_operand.vmem [shape: bf16[2,8,8,128], index: 3, kind: output, shape index: {}]  }
   0x1 LB: > { %s1803_s13 = sadd.s32 4294967295, %s2550_s12   ;;  %p1807_p0 = scmp.ge.s32.totalorder %s2550_s12, 1  ;;  %s2550_s12 = sphi %s2572_s12, %s13_s12  }
   0x2   : > { %p137_p1 = scmp.lt.s32.totalorder %s2550_s12, 3 }
   0x4   : > { %p138_p2 = pnand %p1807_p0, %p137_p1 }
   0x5   : > { %p161_p3 = scmp.lt.s32.totalorder (!%p138_p2), %s1803_s13, 1 }
   0x6   : > { %141 = sbr.rel (%p138_p2) target bundleno = 338 (0x152), region = 32 }
   0xb   : > { %v2421_v0 = vld [vmem:[%s3025_s1 + $0x78] sm:$0xff]  ;;  %v2420_v2 = vld [vmem:[%s3025_s1 + $0x70] sm:$0xff]  ;;  %s3031_s13 = smov (!%p161_p3, %s1803_s13), 1  ;;  %v2419_v6 = vld [vmem:[%s3025_s1 + $0x68] sm:$0xff]  ;;  %vm439_vm0 = vsmask.f32 3328 }
   0xc   : > { %v2429_v1 = vld [vmem:[%s3025_s1 + $0xb8] sm:$0xff]  ;;  %2517 = vmatpush.bf16.msra.mxu1 %v2421_v0  ;;  %293 = vmatpush.bf16.msra.mxu0 %v2421_v0  ;;  %v2428_v3 = vld [vmem:[%s3025_s1 + $0xb0] sm:$0xff]  ;;  %s2533_s24 = smul.u32 288, %s3031_s13  ;;  %v2427_v7 = vld [vmem:[%s3025_s1 + $0xa8] sm:$0xff]  ;;  %vm440_vm1 = vsmask.f32 7440 }
   0xd   : > { %635 = vmatpush.bf16.msra.mxu2 %v2429_v1  ;;  %v2441_v4 = vld [vmem:[%s3025_s1 + $0xf8] sm:$0xff]  ;;  %v2440_v5 = vld [vmem:[%s3025_s1 + $0xf0] sm:$0xff]  ;;  %v2439_v8 = vld [vmem:[%s3025_s1 + $0xe8] sm:$0xff]  ;;  %s2397_s20 = sshll.u32 %s3031_s13, 5 }
   0xe   : > { %770 = vmatpush.bf16.msra.mxu3 %v2441_v4  ;;  %s2607_s4 = scalar_lea.vmem %s3024_s0, %s2533_s24  ;;  %v2418_v10 = vld [vmem:[%s3025_s1 + $0x60] sm:$0xff]  ;;  %v2417_v23 = vld [vmem:[%s3025_s1 + $0x58] sm:$0xff]  ;;  %v2416_v31 = vld [vmem:[%s3025_s1 + $0x50] sm:$0xff]  ;;  %s2994_s23 = scalar_lea.vmem %s3027_s3, %s2397_s20 }
   0xf   : > { %v423_v9 = vld [vmem:[%s2607_s4] sm:$0xf]  ;;  %v425_v11 = vld [vmem:[%s2607_s4 + $0x8] sm:$0xf]  ;;  %v424_v16 = vld [vmem:[%s2607_s4 + $0x4] sm:$0x1] }
  0x10   : > { %2518 = vmatpush.bf16.msra.mxu1 %v2420_v2  ;;  %294 = vmatpush.bf16.msra.mxu0 %v2420_v2  ;;  %v2426_v12 = vld [vmem:[%s3025_s1 + $0xa0] sm:$0xff]  ;;  %v443_v13 = vshrl.u32 %v423_v9, 16  ;;  %v446_v14 = vshll.u32 %v423_v9, 16  ;;  %v457_v15 = vshrl.u32 %v425_v11, 16  ;;  %v426_v17 = vld [vmem:[%s2607_s4 + $0xc] sm:$0x1]  ;;  %vm2644_vm2 = vmor %vm439_vm0, %vm440_vm1 }
  0x11   : > { %636 = vmatpush.bf16.msra.mxu2 %v2428_v3  ;;  %v460_v18 = vshll.u32 %v425_v11, 16  ;;  %v2438_v19 = vld [vmem:[%s3025_s1 + $0xe0] sm:$0xff]  ;;  %v2425_v25 = vld [vmem:[%s3025_s1 + $0x98] sm:$0xff]  ;;  %v452_v27 = vshll.u32 %v424_v16, 16  ;;  %v466_v28 = vshll.u32 %v426_v17, 16  ;;  %v2424_v32 = vld [vmem:[%s3025_s1 + $0x90] sm:$0xff] }
  0x12   : > { %771 = vmatpush.bf16.msra.mxu3 %v2440_v5  ;;  %v445_v20 = vrot.slane %v443_v13, 4  ;;  %v448_v21 = vrot.slane %v446_v14, 5  ;;  %v459_v22 = vrot.slane %v457_v15, 4  ;;  %v2437_v30 = vld [vmem:[%s3025_s1 + $0xd8] sm:$0xff]  ;;  %v427_v37 = vld [vmem:[%s2607_s4 + $0x10] sm:$0xf] }
  0x13   : > { %v462_v24 = vrot.slane %v460_v18, 5  ;;  %v454_v34 = vrot.slane %v452_v27, 5  ;;  %v468_v36 = vrot.slane %v466_v28, 5  ;;  %v429_v39 = vld [vmem:[%s2607_s4 + $0x18] sm:$0xf]  ;;  %v2436_v40 = vld [vmem:[%s3025_s1 + $0xd0] sm:$0xff] }
  0x14   : > { %2519 = vmatpush.bf16.msra.mxu1 %v2419_v6  ;;  %295 = vmatpush.bf16.msra.mxu0 %v2419_v6  ;;  %v449_v26 = vor.u32 %v448_v21, %v445_v20  ;;  %v2415_v41 = vld [vmem:[%s3025_s1 + $0x48] sm:$0xff]  ;;  %v471_v42 = vshrl.u32 %v427_v37, 16  ;;  %v474_v43 = vshll.u32 %v427_v37, 16  ;;  %v485_v47 = vshrl.u32 %v429_v39, 16  ;;  %v2414_v49 = vld [vmem:[%s3025_s1 + $0x40] sm:$0xff]  ;;  %v2409_v52 = vld [vmem:[%s3025_s1 + $0x38] sm:$0xff] }
  0x15   : > { %637 = vmatpush.bf16.msra.mxu2 %v2427_v7  ;;  %v463_v29 = vor.u32 %v462_v24, %v459_v22  ;;  %v2423_v44 = vld [vmem:[%s3025_s1 + $0x88] sm:$0xff]  ;;  %v488_v48 = vshll.u32 %v429_v39, 16  ;;  %v2412_v51 = vld [vmem:[%s2607_s4 + $0x6c] sm:$0xf0]  ;;  %v2422_v54 = vld [vmem:[%s3025_s1 + $0x80] sm:$0xff] }
  0x16   : > { %772 = vmatpush.bf16.msra.mxu3 %v2439_v8  ;;  %v450_v33 = vrot.slane %v449_v26, 4  ;;  %v1845_v50 = vld [vmem:[%s2607_s4 + $0x68] sm:$0xf]  ;;  %v2410_v56 = vld [vmem:[%s2607_s4 + $0x4c] sm:$0xf0]  ;;  %v473_v60 = vrot.slane %v471_v42, 4 }
  0x17   : > { %v464_v35 = vrot.slane %v463_v29, 4  ;;  %v2435_v53 = vld [vmem:[%s3025_s1 + $0xc8] sm:$0xff]  ;;  %v428_v59 = vld [vmem:[%s2607_s4 + $0x14] sm:$0x1]  ;;  %v476_v61 = vrot.slane %v474_v43, 5  ;;  %v487_v62 = vrot.slane %v485_v47, 4  ;;  %v1846_v3 = vor.u32 %v2412_v51, %v1845_v50 }
  0x18   : > { %2520 = vmatpush.bf16.msra.mxu1 %v2418_v10  ;;  %296 = vmatpush.bf16.msra.mxu0 %v2418_v10  ;;  %v455_v45 = vsel %vm2644_vm2, %v450_v33, %v454_v34  ;;  %v1837_v55 = vld [vmem:[%s2607_s4 + $0x48] sm:$0xf]  ;;  %v490_v63 = vrot.slane %v488_v48, 5  ;;  %v2453_v0 = vld [vmem:[%s3025_s1 + $0x138] sm:$0xff]  ;;  %v2434_v6 = vld [vmem:[%s3025_s1 + $0xc0] sm:$0xff]  ;;  %v480_v9 = vshll.u32 %v428_v59, 16 }
  0x19   : > { %638 = vmatpush.bf16.msra.mxu2 %v2426_v12  ;;  %v469_v46 = vsel %vm2644_vm2, %v464_v35, %v468_v36  ;;  %v571_v57 = vunpack.c.l.b16 %v455_v45  ;;  %v2473_v1 = vld [vmem:[%s3025_s1 + $0x1b8] sm:$0xff]  ;;  %v1838_v4 = vor.u32 %v2410_v56, %v1837_v55  ;;  %v2005_v7 = vld [vmem:[%s2607_s4 + $0x90] sm:$0xf]  ;;  %v477_v11 = vor.u32 %v476_v61, %v473_v60  ;;  %v2407_v18 = vld [vmem:[%s3025_s1 + $0x28] sm:$0xff] }
  0x1a   : > { %773 = vmatpush.bf16.msra.mxu3 %v2438_v19  ;;  %v572_v58 = vunpack.c.l.b16 %v469_v46  ;;  %v430_v2 = vld [vmem:[%s2607_s4 + $0x1c] sm:$0x1]  ;;  %v2430_v8 = vld [vmem:[%s2607_s4 + $0x94] sm:$0xf0]  ;;  %v2408_v10 = vld [vmem:[%s3025_s1 + $0x30] sm:$0xff]  ;;  %v491_v12 = vor.u32 %v490_v63, %v487_v62  ;;  %v482_v19 = vrot.slane %v480_v9, 5 }
  0x1b   : > { %v494_v13 = vshll.u32 %v430_v2, 16  ;;  %v2485_v14 = vld [vmem:[%s3025_s1 + $0x1f8] sm:$0xff]  ;;  %v2452_v15 = vld [vmem:[%s3025_s1 + $0x130] sm:$0xff]  ;;  %v2006_v17 = vor.u32 %v2430_v8, %v2005_v7  ;;  %v478_v20 = vrot.slane %v477_v11, 4  ;;  %v431_v24 = vld [vmem:[%s2607_s4 + $0x20] sm:$0xf] }
  0x1c   : > { %2521 = vmatpush.bf16.msra.mxu1 %v2417_v23  ;;  %297 = vmatpush.bf16.msra.mxu0 %v2417_v23  ;;  %v579_v5 = vpack.c.b16 %v572_v58, %v571_v57  ;;  %v2472_v16 = vld [vmem:[%s3025_s1 + $0x1b0] sm:$0xff]  ;;  %v492_v21 = vrot.slane %v491_v12, 4  ;;  %v2471_v26 = vld [vmem:[%s3025_s1 + $0x1a8] sm:$0xff]  ;;  %v499_v28 = vshrl.u32 %v431_v24, 16  ;;  %v502_v29 = vshll.u32 %v431_v24, 16  ;;  %v2450_v36 = vld [vmem:[%s3025_s1 + $0x120] sm:$0xff] }
  0x1d   : > { %639 = vmatpush.bf16.msra.mxu2 %v2425_v25  ;;  %v496_v22 = vrot.slane %v494_v13, 5  ;;  %v2484_v23 = vld [vmem:[%s3025_s1 + $0x1f0] sm:$0xff]  ;;  %v2451_v25 = vld [vmem:[%s3025_s1 + $0x128] sm:$0xff]  ;;  %v2470_v37 = vld [vmem:[%s3025_s1 + $0x1a0] sm:$0xff] }
  0x1e   : > { %774 = vmatpush.bf16.msra.mxu3 %v2437_v30  ;;  %v433_v27 = vld [vmem:[%s2607_s4 + $0x28] sm:$0xf]  ;;  %v2406_v30 = vld [vmem:[%s3025_s1 + $0x20] sm:$0xff]  ;;  %v1849_v39 = vld [vmem:[%s2607_s4 + $0x78] sm:$0xf]  ;;  %v501_v45 = vrot.slane %v499_v28, 4 }
  0x1f   : > { %v513_v33 = vshrl.u32 %v433_v27, 16  ;;  %v516_v34 = vshll.u32 %v433_v27, 16  ;;  %v2483_v35 = vld [vmem:[%s3025_s1 + $0x1e8] sm:$0xff]  ;;  %v2411_v42 = vld [vmem:[%s2607_s4 + $0x5c] sm:$0xf0]  ;;  %v504_v46 = vrot.slane %v502_v29, 5 }
  0x20   : > { %2522 = vmatpush.bf16.msra.mxu1 %v2416_v31  ;;  %298 = vmatpush.bf16.msra.mxu0 %v2416_v31  ;;  %v483_v31 = vsel %vm2644_vm2, %v478_v20, %v482_v19  ;;  %v2405_v47 = vld [vmem:[%s3025_s1 + $0x18] sm:$0xff]  ;;  %v432_v51 = vld [vmem:[%s2607_s4 + $0x24] sm:$0x1]  ;;  %v2009_v56 = vld [vmem:[%s2607_s4 + $0xa0] sm:$0xf] }
  0x21   : > { %640 = vmatpush.bf16.msra.mxu2 %v2424_v32  ;;  %v497_v32 = vsel %vm2644_vm2, %v492_v21, %v496_v22  ;;  %v573_v43 = vunpack.c.l.b16 %v483_v31  ;;  %v515_v48 = vrot.slane %v513_v33, 4  ;;  %v2449_v50 = vld [vmem:[%s3025_s1 + $0x118] sm:$0xff]  ;;  %v2431_v57 = vld [vmem:[%s2607_s4 + $0xa4] sm:$0xf0]  ;;  %v505_v58 = vor.u32 %v504_v46, %v501_v45  ;;  %v2404_v59 = vld [vmem:[%s3025_s1 + $0x10] sm:$0xff] }
  0x22   : > { %775 = vmatpush.bf16.msra.mxu3 %v2436_v40  ;;  %v2413_v40 = vld [vmem:[%s2607_s4 + $0x7c] sm:$0xf0]  ;;  %v508_v60 = vshll.u32 %v432_v51, 16  ;;  %v2448_v63 = vld [vmem:[%s3025_s1 + $0x110] sm:$0xff]  ;;  %v2403_v2 = vld [vmem:[%s3025_s1 + $0x8] sm:$0xff] }
  0x23   : > { %v2482_v7 = vld [vmem:[%s3025_s1 + $0x1e0] sm:$0xff]  ;;  %v435_v8 = vld [vmem:[%s2607_s4 + $0x30] sm:$0xf]  ;;  %v2447_v9 = vld [vmem:[%s3025_s1 + $0x108] sm:$0xff] }
  0x24   : > { %2523 = vmatpush.bf16.msra.mxu1 %v2415_v41  ;;  %299 = vmatpush.bf16.msra.mxu0 %v2415_v41  ;;  %v1841_v41 = vld [vmem:[%s2607_s4 + $0x58] sm:$0xf]  ;;  %v2468_v11 = vld [vmem:[%s3025_s1 + $0x190] sm:$0xff]  ;;  %v527_v12 = vshrl.u32 %v435_v8, 16  ;;  %v530_v13 = vshll.u32 %v435_v8, 16  ;;  %v2446_v21 = vld [vmem:[%s3025_s1 + $0x100] sm:$0xff] }
  0x25   : > { %641 = vmatpush.bf16.msra.mxu2 %v2423_v44  ;;  %v574_v44 = vunpack.c.l.b16 %v497_v32  ;;  %v2461_v20 = vld [vmem:[%s3025_s1 + $0x178] sm:$0xff]  ;;  %v1885_v22 = vld [vmem:[%s2607_s4] sm:$0xf]  ;;  %v2460_v33 = vld [vmem:[%s3025_s1 + $0x170] sm:$0xff] }
  0x26   : > { %776 = vmatpush.bf16.msra.mxu3 %v2435_v53  ;;  %v1850_v53 = vor.u32 %v2413_v40, %v1849_v39  ;;  %v2493_v24 = vld [vmem:[%s3025_s1 + $0x238] sm:$0xff]  ;;  %v529_v29 = vrot.slane %v527_v12, 4  ;;  %v2013_v40 = vld [vmem:[%s2607_s4 + $0xb0] sm:$0xf]  ;;  %v2455_v12 = vld [vmem:[%s3025_s1 + $0x148] sm:$0xff] }
  0x27   : > { %v580_v55 = vpack.c.b16 %v574_v44, %v573_v43  ;;  %v2492_v43 = vld [vmem:[%s3025_s1 + $0x230] sm:$0xff] }
  0x28   : > { %2524 = vmatpush.bf16.msra.mxu1 %v2414_v49  ;;  %300 = vmatpush.bf16.msra.mxu0 %v2414_v49  ;;  %v518_v49 = vrot.slane %v516_v34, 5  ;;  %v436_v34 = vld [vmem:[%s2607_s4 + $0x34] sm:$0x1] }
  0x29   : > { %642 = vmatpush.bf16.msra.mxu2 %v2422_v54  ;;  %v1842_v54 = vor.u32 %v2411_v42, %v1841_v41  ;;  %v2432_v41 = vld [vmem:[%s2607_s4 + $0xb4] sm:$0xf0]  ;;  %v536_v44 = vshll.u32 %v436_v34, 16  ;;  %v2333_v34 = vld [vmem:[%s2607_s4 + $0x10] sm:$0xf] }
  0x2a   : > { %777 = vmatpush.bf16.msra.mxu3 %v2434_v6  ;;  %v519_v61 = vor.u32 %v518_v49, %v515_v48  ;;  %v2467_v48 = vld [vmem:[%s3025_s1 + $0x188] sm:$0xff]  ;;  %v2014_v49 = vor.u32 %v2432_v41, %v2013_v40 }
  0x2b   : > { %311 = vmatmul.bf16.vlgmr.msra.gmra.mxu1 %v1846_v3  ;;  %301 = vmatmul.bf16.vlgmr.msra.gmra.mxu0 %v1838_v4  ;;  %v506_v3 = vrot.slane %v505_v58, 4  ;;  %v510_v4 = vrot.slane %v508_v60, 5  ;;  %v538_v51 = vrot.slane %v536_v44, 5  ;;  %v2479_v58 = vld [vmem:[%s3025_s1 + $0x1c8] sm:$0xff]  ;;  %v1897_v44 = vld [vmem:[%s2607_s4 + $0x30] sm:$0xf] }
  0x2c   : > { %394 = vmatpush.bf16.msrb.mxu1 %v2409_v52  ;;  %905 = vmatpush.bf16.msrb.mxu0 %v2453_v0  ;;  %v434_v52 = vld [vmem:[%s2607_s4 + $0x2c] sm:$0x1]  ;;  %v2010_v0 = vor.u32 %v2431_v57, %v2009_v56  ;;  %v2458_v57 = vld [vmem:[%s3025_s1 + $0x160] sm:$0xff] }
  0x2d   : > { %1286 = vmatpush.bf16.msrb.mxu2 %v2473_v1  ;;  %778 = vmatmul.bf16.vlgmr.msra.gmra.mxu3 %v2006_v17  ;;  %v522_v62 = vshll.u32 %v434_v52, 16  ;;  %v2469_v1 = vld [vmem:[%s3025_s1 + $0x198] sm:$0xff]  ;;  %v2491_v56 = vld [vmem:[%s3025_s1 + $0x228] sm:$0xff] }
  0x2e   : > { %643 = vmatmul.bf16.vlgmr.msra.gmra.mxu2 %v579_v5  ;;  %1421 = vmatpush.bf16.msrb.mxu3 %v2485_v14  ;;  %v520_v5 = vrot.slane %v519_v61, 4  ;;  %v2481_v14 = vld [vmem:[%s3025_s1 + $0x1d8] sm:$0xff] }
  0x2f   : > { %v524_v6 = vrot.slane %v522_v62, 5  ;;  %v2457_v62 = vld [vmem:[%s3025_s1 + $0x158] sm:$0xff] }
  0x30   : > { %395 = vmatpush.bf16.msrb.mxu1 %v2408_v10  ;;  %906 = vmatpush.bf16.msrb.mxu0 %v2452_v15  ;;  %v437_v10 = vld [vmem:[%s2607_s4 + $0x38] sm:$0xf]  ;;  %v2402_v15 = vld [vmem:[%s3025_s1] sm:$0xff] }
  0x31   : > { %1287 = vmatpush.bf16.msrb.mxu2 %v2472_v16  ;;  %v511_v16 = vsel %vm2644_vm2, %v506_v3, %v510_v4  ;;  %v525_v17 = vsel %vm2644_vm2, %v520_v5, %v524_v6  ;;  %v544_v19 = vshll.u32 %v437_v10, 16  ;;  %v2456_v5 = vld [vmem:[%s3025_s1 + $0x150] sm:$0xff] }
  0x32   : > { %1422 = vmatpush.bf16.msrb.mxu3 %v2484_v23  ;;  %v2398_v23 = vld [vmem:[%s2607_s4 + $0x4] sm:$0xf0]  ;;  %v575_v27 = vunpack.c.l.b16 %v511_v16  ;;  %v576_v28 = vunpack.c.l.b16 %v525_v17  ;;  %v2488_v16 = vld [vmem:[%s3025_s1 + $0x210] sm:$0xff]  ;;  %v1893_v17 = vld [vmem:[%s2607_s4 + $0x20] sm:$0xf] }
  0x33   : > { %v546_v32 = vrot.slane %v544_v19, 5  ;;  %v2400_v19 = vld [vmem:[%s2607_s4 + $0x24] sm:$0xf0] }
  0x34   : > { %396 = vmatpush.bf16.msrb.mxu1 %v2407_v18  ;;  %907 = vmatpush.bf16.msrb.mxu0 %v2451_v25  ;;  %v541_v18 = vshrl.u32 %v437_v10, 16  ;;  %v2077_v25 = vld [vmem:[%s2607_s4 + $0xd8] sm:$0xf]  ;;  %v581_v39 = vpack.c.b16 %v576_v28, %v575_v27  ;;  %v2433_v10 = vld [vmem:[%s2607_s4 + $0xc4] sm:$0xf0] }
  0x35   : > { %1288 = vmatpush.bf16.msrb.mxu2 %v2471_v26  ;;  %v2442_v26 = vld [vmem:[%s2607_s4 + $0xdc] sm:$0xf0]  ;;  %v2285_v27 = vld [vmem:[%s2607_s4 + $0x50] sm:$0xf]  ;;  %v2474_v28 = vld [vmem:[%s2607_s4 + $0x54] sm:$0xf0] }
  0x36   : > { %1423 = vmatpush.bf16.msrb.mxu3 %v2483_v35  ;;  %v543_v31 = vrot.slane %v541_v18, 4  ;;  %v438_v35 = vld [vmem:[%s2607_s4 + $0x3c] sm:$0x1]  ;;  %v2487_v18 = vld [vmem:[%s3025_s1 + $0x208] sm:$0xff] }
  0x37   : > { %v550_v46 = vshll.u32 %v438_v35, 16 }
  0x38   : > { %397 = vmatpush.bf16.msrb.mxu1 %v2406_v30  ;;  %908 = vmatpush.bf16.msrb.mxu0 %v2450_v36  ;;  %v532_v30 = vrot.slane %v530_v13, 5  ;;  %v1886_v36 = vor.u32 %v2398_v23, %v1885_v22  ;;  %v547_v45 = vor.u32 %v546_v32, %v543_v31  ;;  %v2478_v13 = vld [vmem:[%s3025_s1 + $0x1c0] sm:$0xff]  ;;  %v2213_v22 = vld [vmem:[%s2607_s4 + $0x8] sm:$0xf]  ;;  %v2462_v23 = vld [vmem:[%s2607_s4 + $0xc] sm:$0xf0] }
  0x39   : > { %1289 = vmatpush.bf16.msrb.mxu2 %v2470_v37  ;;  %v2078_v37 = vor.u32 %v2442_v26, %v2077_v25  ;;  %v2214_v26 = vor.u32 %v2462_v23, %v2213_v22  ;;  %v2123_v31 = vld [vmem:[%s2607_s4 + $0x90] sm:$0xf]  ;;  %v2125_v32 = vld [vmem:[%s2607_s4 + $0x98] sm:$0xf] }
  0x3a   : > { %1424 = vmatpush.bf16.msrb.mxu3 %v2482_v7  ;;  %v533_v42 = vor.u32 %v532_v30, %v529_v29  ;;  %v548_v52 = vrot.slane %v547_v45, 4  ;;  %v2286_v29 = vor.u32 %v2474_v28, %v2285_v27  ;;  %v2486_v30 = vld [vmem:[%s3025_s1 + $0x200] sm:$0xff]  ;;  %v959_v35 = vshrl.u32 %v2123_v31, 16  ;;  %v2401_v45 = vld [vmem:[%s2607_s4 + $0x34] sm:$0xf0] }
  0x3b   : > { %316 = vmatmul.bf16.gmra.mxu1 %v1850_v53  ;;  %306 = vmatmul.bf16.gmra.mxu0 %v1842_v54  ;;  %v552_v53 = vrot.slane %v550_v46, 5  ;;  %v2466_v54 = vld [vmem:[%s3025_s1 + $0x180] sm:$0xff]  ;;  %v2089_v46 = vld [vmem:[%s2607_s4 + $0x108] sm:$0xf] }
  0x3c   : > { %398 = vmatpush.bf16.msrb.mxu1 %v2405_v47  ;;  %909 = vmatpush.bf16.msrb.mxu0 %v2449_v50  ;;  %v2459_v47 = vld [vmem:[%s3025_s1 + $0x168] sm:$0xff]  ;;  %v534_v50 = vrot.slane %v533_v42, 4  ;;  %v1489_v42 = vshrl.u32 %v2333_v34, 16 }
  0x3d   : > { %1290 = vmatpush.bf16.msrb.mxu2 %v2469_v1  ;;  %783 = vmatmul.bf16.gmra.mxu3 %v2010_v0  ;;  %v553_v61 = vsel %vm2644_vm2, %v548_v52, %v552_v53  ;;  %v2399_v0 = vld [vmem:[%s2607_s4 + $0x14] sm:$0xf0]  ;;  %v2081_v1 = vld [vmem:[%s2607_s4 + $0xe8] sm:$0xf] }
  0x3e   : > { %648 = vmatmul.bf16.gmra.mxu2 %v580_v55  ;;  %1425 = vmatpush.bf16.msrb.mxu3 %v2481_v14  ;;  %v2480_v55 = vld [vmem:[%s3025_s1 + $0x1d0] sm:$0xff]  ;;  %v539_v60 = vsel %vm2644_vm2, %v534_v50, %v538_v51  ;;  %v578_v4 = vunpack.c.l.b16 %v553_v61  ;;  %v2489_v14 = vld [vmem:[%s3025_s1 + $0x218] sm:$0xff]  ;;  %v961_v51 = vrot.slane %v959_v35, 4 }
  0x3f   : > { %v577_v3 = vunpack.c.l.b16 %v539_v60  ;;  %v2126_v50 = vld [vmem:[%s2607_s4 + $0x9c] sm:$0x1]  ;;  %v2332_v60 = vld [vmem:[%s2607_s4 + $0xc] sm:$0x1]  ;;  %v2334_v61 = vld [vmem:[%s2607_s4 + $0x14] sm:$0x1] }
  0x40   : > { %399 = vmatpush.bf16.msrb.mxu1 %v2404_v59  ;;  %910 = vmatpush.bf16.msrb.mxu0 %v2448_v63  ;;  %v2490_v59 = vld [vmem:[%s3025_s1 + $0x220] sm:$0xff]  ;;  %v1889_v63 = vld [vmem:[%s2607_s4 + $0x10] sm:$0xf] }
  0x41   : > { %1291 = vmatpush.bf16.msrb.mxu2 %v2468_v11  ;;  %v1890_v6 = vor.u32 %v2399_v0, %v1889_v63  ;;  %v582_v8 = vpack.c.b16 %v578_v4, %v577_v3  ;;  %v982_v0 = vshll.u32 %v2126_v50, 16 }
  0x42   : > { %1426 = vmatpush.bf16.msrb.mxu3 %v2480_v55  ;;  %v2463_v55 = vld [vmem:[%s2607_s4 + $0x1c] sm:$0xf0] }
  0x44   : > { %400 = vmatpush.bf16.msrb.mxu1 %v2403_v2  ;;  %911 = vmatpush.bf16.msrb.mxu0 %v2447_v9  ;;  %v2443_v2 = vld [vmem:[%s2607_s4 + $0xec] sm:$0xf0]  ;;  %v2017_v9 = vld [vmem:[%s2607_s4 + $0xc0] sm:$0xf] }
  0x45   : > { %1292 = vmatpush.bf16.msrb.mxu2 %v2467_v48  ;;  %v2082_v7 = vor.u32 %v2443_v2, %v2081_v1  ;;  %v2018_v11 = vor.u32 %v2433_v10, %v2017_v9  ;;  %v2217_v48 = vld [vmem:[%s2607_s4 + $0x18] sm:$0xf]  ;;  %v1498_v10 = vshll.u32 %v2334_v61, 16 }
  0x46   : > { %1427 = vmatpush.bf16.msrb.mxu3 %v2479_v58  ;;  %v1491_v58 = vrot.slane %v1489_v42, 4  ;;  %v2218_v2 = vor.u32 %v2463_v55, %v2217_v48  ;;  %v2130_v42 = vld [vmem:[%s2607_s4 + $0xac] sm:$0x1] }
  0x47   : > { %v1500_v23 = vrot.slane %v1498_v10, 5 }
  0x48   : > { %401 = vmatpush.bf16.msrb.mxu1 %v2402_v15  ;;  %912 = vmatpush.bf16.msrb.mxu0 %v2446_v21  ;;  %v2454_v15 = vld [vmem:[%s3025_s1 + $0x140] sm:$0xff] }
  0x49   : > { %1293 = vmatpush.bf16.msrb.mxu2 %v2466_v54  ;;  %v2444_v21 = vld [vmem:[%s2607_s4 + $0xfc] sm:$0xf0] }
  0x4a   : > { %1428 = vmatpush.bf16.msrb.mxu3 %v2478_v13  ;;  %v2127_v13 = vld [vmem:[%s2607_s4 + $0xa0] sm:$0xf] }
  0x4b   : > { %402 = vmatmul.bf16.vlgmr.msrb.gmra.mxu1 %v1886_v36  ;;  %913 = vmatmul.bf16.vlgmr.msrb.gmra.mxu0 %v2078_v37  ;;  %v962_v36 = vshll.u32 %v2123_v31, 16  ;;  %v973_v37 = vshrl.u32 %v2125_v32, 16 }
  0x4c   : > { %1151 = vmatpush.bf16.msra.mxu1 %v2461_v20  ;;  %1667 = vmatpush.bf16.msra.mxu0 %v2493_v24  ;;  %v2085_v20 = vld [vmem:[%s2607_s4 + $0xf8] sm:$0xf] }
  0x4d   : > { %788 = vmatmul.bf16.gmra.mxu3 %v2014_v49  ;;  %2525 = vmatpush.bf16.msra.mxu2 %v2493_v24  ;;  %v1894_v24 = vor.u32 %v2400_v19, %v1893_v17  ;;  %v2086_v25 = vor.u32 %v2444_v21, %v2085_v20  ;;  %v2124_v49 = vld [vmem:[%s2607_s4 + $0x94] sm:$0x1]  ;;  %v964_v52 = vrot.slane %v962_v36, 5  ;;  %v975_v53 = vrot.slane %v973_v37, 4  ;;  %v2337_v19 = vld [vmem:[%s2607_s4 + $0x20] sm:$0xf] }
  0x4e   : > { %653 = vmatmul.bf16.gmra.mxu2 %v581_v39  ;;  %v976_v39 = vshll.u32 %v2125_v32, 16  ;;  %v968_v63 = vshll.u32 %v2124_v49, 16  ;;  %v1520_v31 = vshll.u32 %v2337_v19, 16  ;;  %v2128_v36 = vld [vmem:[%s2607_s4 + $0xa4] sm:$0x1] }
  0x4f   : > { %v965_v3 = vor.u32 %v964_v52, %v961_v51  ;;  %v2336_v51 = vld [vmem:[%s2607_s4 + $0x1c] sm:$0x1]  ;;  %v2338_v52 = vld [vmem:[%s2607_s4 + $0x24] sm:$0x1] }
  0x50   : > { %1152 = vmatpush.bf16.msra.mxu1 %v2460_v33  ;;  %1668 = vmatpush.bf16.msra.mxu0 %v2492_v43  ;;  %v2331_v33 = vld [vmem:[%s2607_s4 + $0x8] sm:$0xf]  ;;  %v978_v54 = vrot.slane %v976_v39, 5 }
  0x51   : > { %2526 = vmatpush.bf16.msra.mxu2 %v2492_v43  ;;  %v1475_v40 = vshrl.u32 %v2331_v33, 16  ;;  %v1478_v41 = vshll.u32 %v2331_v33, 16  ;;  %v1492_v43 = vshll.u32 %v2333_v34, 16 }
  0x52   : > { %v979_v4 = vor.u32 %v978_v54, %v975_v53  ;;  %v2221_v53 = vld [vmem:[%s2607_s4 + $0x28] sm:$0xf]  ;;  %v2464_v54 = vld [vmem:[%s2607_s4 + $0x2c] sm:$0xf0] }
  0x54   : > { %1153 = vmatpush.bf16.msra.mxu1 %v2459_v47  ;;  %1669 = vmatpush.bf16.msra.mxu0 %v2491_v56  ;;  %v2445_v47 = vld [vmem:[%s2607_s4 + $0x10c] sm:$0xf0] }
  0x55   : > { %2527 = vmatpush.bf16.msra.mxu2 %v2491_v56  ;;  %v1477_v56 = vrot.slane %v1475_v40, 4  ;;  %v2090_v1 = vor.u32 %v2445_v47, %v2089_v46  ;;  %v1522_v46 = vrot.slane %v1520_v31, 5 }
  0x58   : > { %1154 = vmatpush.bf16.msra.mxu1 %v2458_v57  ;;  %1670 = vmatpush.bf16.msra.mxu0 %v2490_v59  ;;  %v1480_v57 = vrot.slane %v1478_v41, 5 }
  0x59   : > { %2528 = vmatpush.bf16.msra.mxu2 %v2490_v59  ;;  %v1494_v59 = vrot.slane %v1492_v43, 5 }
  0x5b   : > { %407 = vmatmul.bf16.gmra.mxu1 %v1890_v6  ;;  %918 = vmatmul.bf16.gmra.mxu0 %v2082_v7  ;;  %v2475_v6 = vld [vmem:[%s2607_s4 + $0x64] sm:$0xf0]  ;;  %v1481_v7 = vor.u32 %v1480_v57, %v1477_v56  ;;  %v1495_v9 = vor.u32 %v1494_v59, %v1491_v58  ;;  %v996_v56 = vshll.u32 %v2128_v36, 16  ;;  %v1010_v58 = vshll.u32 %v2130_v42, 16  ;;  %v2132_v42 = vld [vmem:[%s2607_s4 + $0xb4] sm:$0x1] }
  0x5c   : > { %1155 = vmatpush.bf16.msra.mxu1 %v2457_v62  ;;  %1671 = vmatpush.bf16.msra.mxu0 %v2489_v14  ;;  %v1898_v62 = vor.u32 %v2401_v45, %v1897_v44 }
  0x5d   : > { %793 = vmatmul.bf16.gmra.mxu3 %v2018_v11  ;;  %2529 = vmatpush.bf16.msra.mxu2 %v2489_v14  ;;  %v970_v11 = vrot.slane %v968_v63, 5  ;;  %v2129_v14 = vld [vmem:[%s2607_s4 + $0xa8] sm:$0xf]  ;;  %v1482_v20 = vrot.slane %v1481_v7, 4  ;;  %v1496_v22 = vrot.slane %v1495_v9, 4  ;;  %v1012_v7 = vrot.slane %v1010_v58, 5 }
  0x5e   : > { %658 = vmatmul.bf16.gmra.mxu2 %v582_v8  ;;  %v1484_v8 = vshll.u32 %v2332_v60, 16  ;;  %v1004_v27 = vshll.u32 %v2129_v14, 16  ;;  %v1512_v60 = vshll.u32 %v2336_v51, 16  ;;  %v2225_v51 = vld [vmem:[%s2607_s4 + $0x38] sm:$0xf] }
  0x5f   : > { %v1501_v35 = vsel %vm2644_vm2, %v1496_v22, %v1500_v23  ;;  %v2344_v58 = vld [vmem:[%s2607_s4 + $0x3c] sm:$0x1] }
  0x60   : > { %1156 = vmatpush.bf16.msra.mxu1 %v2456_v5  ;;  %1672 = vmatpush.bf16.msra.mxu0 %v2488_v16  ;;  %v2289_v5 = vld [vmem:[%s2607_s4 + $0x60] sm:$0xf]  ;;  %v1486_v21 = vrot.slane %v1484_v8, 5  ;;  %v1006_v41 = vrot.slane %v1004_v27, 5  ;;  %v1604_v50 = vunpack.c.l.b16 %v1501_v35  ;;  %v1514_v9 = vrot.slane %v1512_v60, 5 }
  0x61   : > { %2530 = vmatpush.bf16.msra.mxu2 %v2488_v16  ;;  %v980_v16 = vrot.slane %v979_v4, 4  ;;  %v2290_v17 = vor.u32 %v2475_v6, %v2289_v5  ;;  %v998_v5 = vrot.slane %v996_v56, 5  ;;  %v2465_v56 = vld [vmem:[%s2607_s4 + $0x3c] sm:$0xf0] }
  0x62   : > { %v1487_v34 = vsel %vm2644_vm2, %v1482_v20, %v1486_v21  ;;  %v2343_v21 = vld [vmem:[%s2607_s4 + $0x38] sm:$0xf] }
  0x63   : > { %v1603_v49 = vunpack.c.l.b16 %v1487_v34  ;;  %v1562_v34 = vshll.u32 %v2343_v21, 16 }
  0x64   : > { %1157 = vmatpush.bf16.msra.mxu1 %v2455_v12  ;;  %1673 = vmatpush.bf16.msra.mxu0 %v2487_v18  ;;  %v984_v12 = vrot.slane %v982_v0, 5 }
  0x65   : > { %2531 = vmatpush.bf16.msra.mxu2 %v2487_v18  ;;  %v2335_v18 = vld [vmem:[%s2607_s4 + $0x18] sm:$0xf]  ;;  %v1611_v0 = vpack.c.b16 %v1604_v50, %v1603_v49 }
  0x66   : > { %v1503_v28 = vshrl.u32 %v2335_v18, 16  ;;  %v985_v33 = vsel %vm2644_vm2, %v980_v16, %v984_v12  ;;  %v2131_v12 = vld [vmem:[%s2607_s4 + $0xb0] sm:$0xf] }
  0x67   : > { %v1088_v48 = vunpack.c.l.b16 %v985_v33  ;;  %v2341_v16 = vld [vmem:[%s2607_s4 + $0x30] sm:$0xf]  ;;  %v1018_v20 = vshll.u32 %v2131_v12, 16  ;;  %v1559_v33 = vshrl.u32 %v2343_v21, 16 }
  0x68   : > { %1158 = vmatpush.bf16.msra.mxu1 %v2454_v15  ;;  %1674 = vmatpush.bf16.msra.mxu0 %v2486_v30  ;;  %v966_v15 = vrot.slane %v965_v3, 4  ;;  %v1505_v43 = vrot.slane %v1503_v28, 4  ;;  %v2476_v3 = vld [vmem:[%s2607_s4 + $0x74] sm:$0xf0] }
  0x69   : > { %2532 = vmatpush.bf16.msra.mxu2 %v2486_v30  ;;  %v1517_v30 = vshrl.u32 %v2337_v19, 16  ;;  %v1015_v19 = vshrl.u32 %v2131_v12, 16  ;;  %v1020_v36 = vrot.slane %v1018_v20, 5 }
  0x6a   : > { %v971_v32 = vsel %vm2644_vm2, %v966_v15, %v970_v11  ;;  %v2339_v15 = vld [vmem:[%s2607_s4 + $0x28] sm:$0xf] }
  0x6b   : > { %412 = vmatmul.bf16.gmra.mxu1 %v1894_v24  ;;  %923 = vmatmul.bf16.gmra.mxu0 %v2086_v25  ;;  %v987_v24 = vshrl.u32 %v2127_v13, 16  ;;  %v990_v25 = vshll.u32 %v2127_v13, 16  ;;  %v1519_v45 = vrot.slane %v1517_v30, 4  ;;  %v1087_v47 = vunpack.c.l.b16 %v971_v32 }
  0x6c   : > { %v1531_v27 = vshrl.u32 %v2339_v15, 16  ;;  %v1534_v28 = vshll.u32 %v2339_v15, 16  ;;  %v1548_v30 = vshll.u32 %v2341_v16, 16  ;;  %v1017_v35 = vrot.slane %v1015_v19, 4 }
  0x6d   : > { %1429 = vmatmul.bf16.vlgmr.msrb.gmra.mxu3 %v2286_v29  ;;  %v1506_v29 = vshll.u32 %v2335_v18, 16  ;;  %v989_v37 = vrot.slane %v987_v24, 4  ;;  %v992_v39 = vrot.slane %v990_v25, 5  ;;  %v1523_v61 = vor.u32 %v1522_v46, %v1519_v45  ;;  %v2340_v46 = vld [vmem:[%s2607_s4 + $0x2c] sm:$0x1] }
  0x6e   : > { %1294 = vmatmul.bf16.vlgmr.msrb.gmra.mxu2 %v2214_v26  ;;  %v1001_v26 = vshrl.u32 %v2129_v14, 16  ;;  %v1095_v63 = vpack.c.b16 %v1088_v48, %v1087_v47  ;;  %v2133_v14 = vld [vmem:[%s2607_s4 + $0xb8] sm:$0xf]  ;;  %v1533_v47 = vrot.slane %v1531_v27, 4  ;;  %v1536_v48 = vrot.slane %v1534_v28, 5 }
  0x6f   : > { %v1508_v44 = vrot.slane %v1506_v29, 5  ;;  %v993_v55 = vor.u32 %v992_v39, %v989_v37  ;;  %v1524_v10 = vrot.slane %v1523_v61, 4  ;;  %v1029_v24 = vshrl.u32 %v2133_v14, 16  ;;  %v2137_v27 = vld [vmem:[%s2607_s4 + $0xc8] sm:$0xf] }
  0x70   : > { %v1003_v40 = vrot.slane %v1001_v26, 4  ;;  %v1032_v25 = vshll.u32 %v2133_v14, 16  ;;  %v2345_v26 = vld [vmem:[%s2607_s4 + $0x40] sm:$0xf]  ;;  %v1545_v29 = vshrl.u32 %v2341_v16, 16  ;;  %v1550_v50 = vrot.slane %v1548_v30, 5 }
  0x71   : > { %v1509_v59 = vor.u32 %v1508_v44, %v1505_v43  ;;  %v994_v4 = vrot.slane %v993_v55, 4  ;;  %v1573_v37 = vshrl.u32 %v2345_v26, 16  ;;  %v1576_v39 = vshll.u32 %v2345_v26, 16  ;;  %v2134_v43 = vld [vmem:[%s2607_s4 + $0xbc] sm:$0x1] }
  0x72   : > { %v1007_v57 = vor.u32 %v1006_v41, %v1003_v40  ;;  %v1031_v44 = vrot.slane %v1029_v24, 4  ;;  %v1034_v45 = vrot.slane %v1032_v25, 5  ;;  %v1547_v49 = vrot.slane %v1545_v29, 4  ;;  %v2135_v24 = vld [vmem:[%s2607_s4 + $0xc0] sm:$0xf] }
  0x73   : > { %v1510_v8 = vrot.slane %v1509_v59, 4  ;;  %v1575_v59 = vrot.slane %v1573_v37, 4  ;;  %v1578_v60 = vrot.slane %v1576_v39, 5  ;;  %v1024_v61 = vshll.u32 %v2132_v42, 16 }
  0x74   : > { %v1008_v6 = vrot.slane %v1007_v57, 4  ;;  %v1021_v57 = vor.u32 %v1020_v36, %v1017_v35  ;;  %v1057_v35 = vshrl.u32 %v2137_v27, 16  ;;  %v1060_v36 = vshll.u32 %v2137_v27, 16 }
  0x75   : > { %v1515_v22 = vsel %vm2644_vm2, %v1510_v8, %v1514_v9  ;;  %v2477_v8 = vld [vmem:[%s2607_s4 + $0x84] sm:$0xf0]  ;;  %v1579_v12 = vor.u32 %v1578_v60, %v1575_v59  ;;  %v1026_v14 = vrot.slane %v1024_v61, 5 }
  0x76   : > { %v1013_v18 = vsel %vm2644_vm2, %v1008_v6, %v1012_v7  ;;  %v1605_v40 = vunpack.c.l.b16 %v1515_v22  ;;  %v2226_v6 = vor.u32 %v2465_v56, %v2225_v51  ;;  %v2297_v7 = vld [vmem:[%s2607_s4 + $0x80] sm:$0xf] }
  0x77   : > { %v1090_v32 = vunpack.c.l.b16 %v1013_v18  ;;  %v2298_v18 = vor.u32 %v2477_v8, %v2297_v7  ;;  %v1580_v25 = vrot.slane %v1579_v12, 4 }
  0x7b   : > { %417 = vmatmul.bf16.gmra.mxu1 %v1898_v62  ;;  %928 = vmatmul.bf16.gmra.mxu0 %v2090_v1  ;;  %v1526_v62 = vshll.u32 %v2338_v52, 16  ;;  %v2222_v1 = vor.u32 %v2464_v54, %v2221_v53  ;;  %v2342_v52 = vld [vmem:[%s2607_s4 + $0x34] sm:$0x1]  ;;  %v1561_v53 = vrot.slane %v1559_v33, 4  ;;  %v1564_v54 = vrot.slane %v1562_v34, 5 }
  0x7c   : > { %v1046_v34 = vshll.u32 %v2135_v24, 16 }
  0x7d   : > { %1434 = vmatmul.bf16.gmra.mxu3 %v2290_v17  ;;  %v1528_v11 = vrot.slane %v1526_v62, 5  ;;  %v999_v17 = vsel %vm2644_vm2, %v994_v4, %v998_v5  ;;  %v1035_v62 = vor.u32 %v1034_v45, %v1031_v44  ;;  %v1551_v4 = vor.u32 %v1550_v50, %v1547_v49  ;;  %v2138_v50 = vld [vmem:[%s2607_s4 + $0xcc] sm:$0x1] }
  0x7e   : > { %1299 = vmatmul.bf16.gmra.mxu2 %v2218_v2  ;;  %v2293_v2 = vld [vmem:[%s2607_s4 + $0x70] sm:$0xf]  ;;  %v1089_v31 = vunpack.c.l.b16 %v999_v17  ;;  %v1554_v5 = vshll.u32 %v2342_v52, 16  ;;  %v1565_v9 = vor.u32 %v1564_v54, %v1561_v53  ;;  %v1062_v49 = vrot.slane %v1060_v36, 5 }
  0x7f   : > { %v2294_v13 = vor.u32 %v2476_v3, %v2293_v2  ;;  %v1529_v23 = vsel %vm2644_vm2, %v1524_v10, %v1528_v11  ;;  %v1537_v3 = vor.u32 %v1536_v48, %v1533_v47  ;;  %v1568_v10 = vshll.u32 %v2344_v58, 16 }
  0x80   : > { %v1606_v41 = vunpack.c.l.b16 %v1529_v23  ;;  %v1096_v55 = vpack.c.b16 %v1090_v32, %v1089_v31  ;;  %v1022_v11 = vrot.slane %v1021_v57, 4  ;;  %v1036_v15 = vrot.slane %v1035_v62, 4 }
  0x81   : > { %v1538_v19 = vrot.slane %v1537_v3, 4  ;;  %v1552_v20 = vrot.slane %v1551_v4, 4  ;;  %v1556_v21 = vrot.slane %v1554_v5, 5  ;;  %v1566_v22 = vrot.slane %v1565_v9, 4 }
  0x82   : > { %v1612_v2 = vpack.c.b16 %v1606_v41, %v1605_v40  ;;  %v1570_v23 = vrot.slane %v1568_v10, 5  ;;  %v1027_v28 = vsel %vm2644_vm2, %v1022_v11, %v1026_v14  ;;  %v1043_v32 = vshrl.u32 %v2135_v24, 16 }
  0x83   : > { %v1557_v31 = vsel %vm2644_vm2, %v1552_v20, %v1556_v21  ;;  %v1091_v39 = vunpack.c.l.b16 %v1027_v28  ;;  %v1048_v47 = vrot.slane %v1046_v34, 5  ;;  %v1059_v48 = vrot.slane %v1057_v35, 4 }
  0x84   : > { %v1571_v33 = vsel %vm2644_vm2, %v1566_v22, %v1570_v23  ;;  %v1608_v42 = vunpack.c.l.b16 %v1557_v31  ;;  %v1045_v44 = vrot.slane %v1043_v32, 4  ;;  %v1066_v59 = vshll.u32 %v2138_v50, 16 }
  0x85   : > { %v1063_v58 = vor.u32 %v1062_v49, %v1059_v48 }
  0x86   : > { %v1049_v57 = vor.u32 %v1048_v47, %v1045_v44 }
  0x87   : > { %v1064_v62 = vrot.slane %v1063_v58, 4 }
  0x88   : > { %v1050_v60 = vrot.slane %v1049_v57, 4 }
  0x8b   : > { %1159 = vmatmul.bf16.vlgmr.msra.gmra.mxu1 %v1095_v63  ;;  %1675 = vmatmul.bf16.vlgmr.msra.gmra.mxu0 %v1611_v0  ;;  %v1038_v63 = vshll.u32 %v2134_v43, 16  ;;  %v1540_v0 = vshll.u32 %v2340_v46, 16  ;;  %v1609_v43 = vunpack.c.l.b16 %v1571_v33  ;;  %v2136_v46 = vld [vmem:[%s2607_s4 + $0xc4] sm:$0x1] }
  0x8c   : > { %v1052_v53 = vshll.u32 %v2136_v46, 16 }
  0x8d   : > { %1439 = vmatmul.bf16.gmra.mxu3 %v2294_v13  ;;  %v1040_v16 = vrot.slane %v1038_v63, 5  ;;  %v1542_v17 = vrot.slane %v1540_v0, 5  ;;  %v1068_v63 = vrot.slane %v1066_v59, 5 }
  0x8e   : > { %1304 = vmatmul.bf16.gmra.mxu2 %v2222_v1  ;;  %v2346_v1 = vld [vmem:[%s2607_s4 + $0x44] sm:$0x1]  ;;  %v1054_v61 = vrot.slane %v1052_v53, 5 }
  0x8f   : > { %v1582_v13 = vshll.u32 %v2346_v1, 16  ;;  %v1041_v29 = vsel %vm2644_vm2, %v1036_v15, %v1040_v16  ;;  %v1543_v30 = vsel %vm2644_vm2, %v1538_v19, %v1542_v17  ;;  %v1069_v4 = vsel %vm2644_vm2, %v1064_v62, %v1068_v63 }
  0x90   : > { %v1092_v40 = vunpack.c.l.b16 %v1041_v29  ;;  %v1607_v41 = vunpack.c.l.b16 %v1543_v30  ;;  %v1055_v3 = vsel %vm2644_vm2, %v1050_v60, %v1054_v61  ;;  %v1094_v7 = vunpack.c.l.b16 %v1069_v4 }
  0x91   : > { %v1584_v26 = vrot.slane %v1582_v13, 5 }
  0x92   : > { %v1097_v51 = vpack.c.b16 %v1092_v40, %v1091_v39  ;;  %v1613_v52 = vpack.c.b16 %v1608_v42, %v1607_v41 }
  0x93   : > { %v1585_v37 = vsel %vm2644_vm2, %v1580_v25, %v1584_v26 }
  0x94   : > { %v1610_v45 = vunpack.c.l.b16 %v1585_v37 }
  0x96   : > { %v1614_v56 = vpack.c.b16 %v1610_v45, %v1609_v43 }
  0x9b   : > { %1164 = vmatmul.bf16.gmra.mxu1 %v1096_v55  ;;  %1680 = vmatmul.bf16.gmra.mxu0 %v1612_v2 }
  0x9d   : > { %1444 = vmatmul.bf16.gmra.mxu3 %v2298_v18 }
  0x9e   : > { %1309 = vmatmul.bf16.gmra.mxu2 %v2226_v6  ;;  %v1093_v6 = vunpack.c.l.b16 %v1055_v3 }
  0xa0   : > { %v1098_v8 = vpack.c.b16 %v1094_v7, %v1093_v6 }
  0xa8   : > { %v312_v54 = vpop.f32.mrf.mxu1  ;;  %v302_v55 = vpop.f32.mrf.mxu0 }
  0xab   : > { %1169 = vmatmul.bf16.gmra.mxu1 %v1097_v51  ;;  %1685 = vmatmul.bf16.gmra.mxu0 %v1613_v52 }
  0xae   : > { %1690 = vmatmul.bf16.vlgmr.msra.gmra.mxu2 %v1614_v56 }
  0xb0   : > { %v314_v1 = vpop.f32.mrf.mxu1  ;;  %v304_v2 = vpop.f32.mrf.mxu0 }
  0xb1   : > { %v644_v0 = vpop.f32.mrf.mxu2  ;;  %v779_v5 = vpop.f32.mrf.mxu3 }
  0xb8   : > { %v317_v10 = vpop.f32.mrf.mxu1  ;;  %v307_v11 = vpop.f32.mrf.mxu0 }
  0xb9   : > { %v646_v9 = vpop.f32.mrf.mxu2  ;;  %v2952_v12 = vpop.f32.mrf.mxu3 }
  0xbb   : > { %1174 = vmatmul.bf16.gmra.mxu1 %v1098_v8 }
  0xc0   : > { %v319_v14 = vpop.f32.mrf.mxu1  ;;  %v309_v15 = vpop.f32.mrf.mxu0 }
  0xc1   : > { %v649_v13 = vpop.f32.mrf.mxu2  ;;  %v784_v16 = vpop.f32.mrf.mxu3 }
  0xc8   : > { %v403_v18 = vpop.f32.mrf.mxu1  ;;  %v914_v19 = vpop.f32.mrf.mxu0 }
  0xc9   : > { %v651_v17 = vpop.f32.mrf.mxu2  ;;  %v404_v20 = vadd.f32 %v403_v18, %v302_v55  ;;  %v2954_v21 = vpop.f32.mrf.mxu3 }
  0xcb   : > { %v664_v38 = vadd.f32 %v644_v0, %v404_v20 }
  0xcd   : > { %v799_v22 = vadd.f32 %v779_v5, %v664_v38 }
  0xcf   : > { %v934_v23 = vadd.f32 %v914_v19, %v799_v22 }
  0xd0   : > { %v405_v25 = vpop.f32.mrf.mxu1  ;;  %v916_v26 = vpop.f32.mrf.mxu0 }
  0xd1   : > { %v654_v24 = vpop.f32.mrf.mxu2  ;;  %v406_v27 = vadd.f32 %v405_v25, %v304_v2  ;;  %v789_v29 = vpop.f32.mrf.mxu3 }
  0xd3   : > { %v665_v28 = vadd.f32 %v646_v9, %v406_v27 }
  0xd8   : > { %v408_v31 = vpop.f32.mrf.mxu1  ;;  %v919_v32 = vpop.f32.mrf.mxu0 }
  0xd9   : > { %v656_v30 = vpop.f32.mrf.mxu2  ;;  %v409_v33 = vadd.f32 %v408_v31, %v307_v11  ;;  %v2956_v39 = vpop.f32.mrf.mxu3 }
  0xdb   : > { %v666_v34 = vadd.f32 %v649_v13, %v409_v33 }
  0xdd   : > { %v801_v35 = vadd.f32 %v784_v16, %v666_v34 }
  0xdf   : > { %v936_v36 = vadd.f32 %v919_v32, %v801_v35 }
  0xe0   : > { %v410_v40 = vpop.f32.mrf.mxu1  ;;  %v2958_v41 = vpop.f32.mrf.mxu0 }
  0xe1   : > { %v659_v37 = vpop.f32.mrf.mxu2  ;;  %v411_v42 = vadd.f32 %v410_v40, %v309_v15  ;;  %v794_v48 = vpop.f32.mrf.mxu3  ;;  %v800_v15 = vadd.f32 %v2952_v12, %v665_v28  ;;  %v2984_v12 = vld [vmem:[%s3026_s2 + $0x1] ss:$0 sm:$0xff] }
  0xe3   : > { %v667_v43 = vadd.f32 %v651_v17, %v411_v42  ;;  %v935_v17 = vadd.f32 %v916_v26, %v800_v15 }
  0xe5   : > { %v802_v33 = vadd.f32 %v2954_v21, %v667_v43 }
  0xe8   : > { %v413_v45 = vpop.f32.mrf.mxu1  ;;  %v924_v46 = vpop.f32.mrf.mxu0 }
  0xe9   : > { %v661_v44 = vpop.f32.mrf.mxu2  ;;  %v414_v47 = vadd.f32 %v413_v45, %v312_v54  ;;  %v2966_v58 = vpop.f32.mrf.mxu3 }
  0xeb   : > { %v668_v49 = vadd.f32 %v654_v24, %v414_v47 }
  0xed   : > { %v803_v50 = vadd.f32 %v789_v29, %v668_v49 }
  0xef   : > { %v2960_v51 = vadd.f32 %v924_v46, %v803_v50  ;;  %v937_v46 = vadd.f32 %v2958_v41, %v802_v33 }
  0xf0   : > { %v415_v53 = vpop.f32.mrf.mxu1  ;;  %v2962_v55 = vpop.f32.mrf.mxu0 }
  0xf1   : > { %v1295_v52 = vpop.f32.mrf.mxu2  ;;  %v416_v56 = vadd.f32 %v415_v53, %v314_v1  ;;  %v1430_v0 = vpop.f32.mrf.mxu3 }
  0xf3   : > { %v2964_v57 = vadd.f32 %v656_v30, %v416_v56 }
  0xf8   : > { %v418_v60 = vpop.f32.mrf.mxu1  ;;  %v929_v61 = vpop.f32.mrf.mxu0 }
  0xf9   : > { %v1297_v59 = vpop.f32.mrf.mxu2  ;;  %v419_v62 = vadd.f32 %v418_v60, %v317_v10  ;;  %v1432_v1 = vpop.f32.mrf.mxu3 }
  0xfb   : > { %v670_v63 = vadd.f32 %v659_v37, %v419_v62 }
  0xfd   : > { %v805_v54 = vadd.f32 %v794_v48, %v670_v63 }
  0xff   : > { %v2968_v2 = vadd.f32 %v929_v61, %v805_v54  ;;  %v804_v54 = vadd.f32 %v2956_v39, %v2964_v57 }
 0x100   : > { %v420_v4 = vpop.f32.mrf.mxu1  ;;  %v2970_v5 = vpop.f32.mrf.mxu0 }
 0x101   : > { %v1300_v3 = vpop.f32.mrf.mxu2  ;;  %v421_v6 = vadd.f32 %v420_v4, %v319_v14  ;;  %v2978_v14 = vld [vmem:[%s3026_s2] ss:$0 sm:$0xff]  ;;  %v1435_v22 = vpop.f32.mrf.mxu3 }
 0x103   : > { %v2972_v7 = vadd.f32 %v661_v44, %v421_v6 }
 0x108   : > { %v1160_v8 = vpop.f32.mrf.mxu1  ;;  %v1676_v9 = vpop.f32.mrf.mxu0 }
 0x109   : > { %v1180_v11 = vadd.f32 %v1160_v8, %v934_v23  ;;  %v1302_v13 = vpop.f32.mrf.mxu2  ;;  %v1437_v37 = vpop.f32.mrf.mxu3  ;;  %v939_v8 = vadd.f32 %v2962_v55, %v804_v54 }
 0x10b   : > { %v1315_v10 = vadd.f32 %v1295_v52, %v1180_v11 }
 0x10d   : > { %v1450_v16 = vadd.f32 %v1430_v0, %v1315_v10 }
 0x10f   : > { %v1696_v20 = vadd.f32 %v1676_v9, %v1450_v16 }
 0x110   : > { %v1162_v18 = vpop.f32.mrf.mxu1  ;;  %v1678_v19 = vpop.f32.mrf.mxu0 }
 0x111   : > { %v1181_v38 = vadd.f32 %v1162_v18, %v935_v17  ;;  %v1305_v25 = vpop.f32.mrf.mxu2  ;;  %v1706_v23 = vmul.f32 %v2978_v14, %v1696_v20  ;;  %v1440_v53 = vpop.f32.mrf.mxu3 }
 0x113   : > { %v1316_v24 = vadd.f32 %v1297_v59, %v1181_v38  ;;  %v1716_v30 = vadd.f32 %v2984_v12, %v1706_v23 }
 0x115   : > { %v1451_v26 = vadd.f32 %v1432_v1, %v1316_v24  ;;  %v1724_v40 = vmax.f32 %v1716_v30, 0.0  ;;  %v806_v24 = vadd.f32 %v2966_v58, %v2972_v7 }
 0x117   : > { %v1697_v27 = vadd.f32 %v1678_v19, %v1451_v26  ;;  %v941_v30 = vadd.f32 %v2970_v5, %v806_v24 }
 0x118   : > { %v1165_v28 = vpop.f32.mrf.mxu1  ;;  %v1681_v29 = vpop.f32.mrf.mxu0 }
 0x119   : > { %v1707_v31 = vmul.f32 %v2978_v14, %v1697_v27  ;;  %v1182_v32 = vadd.f32 %v1165_v28, %v936_v36  ;;  %v1307_v45 = vpop.f32.mrf.mxu2  ;;  %v1442_v11 = vpop.f32.mrf.mxu3 }
 0x11b   : > { %v1717_v34 = vadd.f32 %v2984_v12, %v1707_v31  ;;  %v1317_v35 = vadd.f32 %v1300_v3, %v1182_v32 }
 0x11d   : > { %v1725_v42 = vmax.f32 %v1717_v34, 0.0  ;;  %v1452_v44 = vadd.f32 %v1435_v22, %v1317_v35 }
 0x11f   : > { %v2497_v36 = vpack.c.bf16 %v1725_v42, %v1724_v40  ;;  %v1698_v43 = vadd.f32 %v1681_v29, %v1452_v44 }
 0x120   : > { %v1167_v47 = vpop.f32.mrf.mxu1  ;;  %v1683_v21 = vpop.f32.mrf.mxu0 }
 0x121   : > { %2498 = vst [vmem:[%s2994_s23] sm:$0xff] %v2497_v36   ;;  %v1183_v48 = vadd.f32 %v1167_v47, %v937_v46  ;;  %v1708_v50 = vmul.f32 %v2978_v14, %v1698_v43  ;;  %v1310_v59 = vpop.f32.mrf.mxu2  ;;  %v1445_v22 = vpop.f32.mrf.mxu3 }
 0x123   : > { %v1318_v49 = vadd.f32 %v1302_v13, %v1183_v48  ;;  %v1718_v61 = vadd.f32 %v2984_v12, %v1708_v50 }
 0x125   : > { %v1453_v52 = vadd.f32 %v1437_v37, %v1318_v49  ;;  %v1726_v4 = vmax.f32 %v1718_v61, 0.0 }
 0x127   : > { %v1699_v56 = vadd.f32 %v1683_v21, %v1453_v52 }
 0x128   : > { %v1170_v60 = vpop.f32.mrf.mxu1  ;;  %v1686_v63 = vpop.f32.mrf.mxu0 }
 0x129   : > { %v1709_v62 = vmul.f32 %v2978_v14, %v1699_v56  ;;  %v1184_v41 = vadd.f32 %v1170_v60, %v2960_v51  ;;  %v1312_v16 = vpop.f32.mrf.mxu2  ;;  %v1447_v35 = vpop.f32.mrf.mxu3 }
 0x12b   : > { %v1719_v0 = vadd.f32 %v2984_v12, %v1709_v62  ;;  %v1319_v3 = vadd.f32 %v1305_v25, %v1184_v41 }
 0x12d   : > { %v1727_v6 = vmax.f32 %v1719_v0, 0.0  ;;  %v1454_v1 = vadd.f32 %v1440_v53, %v1319_v3 }
 0x12f   : > { %v2502_v9 = vpack.c.bf16 %v1727_v6, %v1726_v4  ;;  %v1700_v15 = vadd.f32 %v1686_v63, %v1454_v1 }
 0x130   : > { %v1172_v13 = vpop.f32.mrf.mxu1  ;;  %v1688_v17 = vpop.f32.mrf.mxu0 }
 0x131   : > { %2514 = vst [vmem:[%s2994_s23 + $0x8] sm:$0xff] %v2502_v9   ;;  %v1185_v10 = vadd.f32 %v1172_v13, %v939_v8  ;;  %v1710_v18 = vmul.f32 %v2978_v14, %v1700_v15  ;;  %v1691_v26 = vpop.f32.mrf.mxu2 }
 0x133   : > { %v1320_v51 = vadd.f32 %v1307_v45, %v1185_v10  ;;  %v1720_v20 = vadd.f32 %v2984_v12, %v1710_v18 }
 0x135   : > { %v1455_v39 = vadd.f32 %v1442_v11, %v1320_v51  ;;  %v1728_v27 = vmax.f32 %v1720_v20, 0.0 }
 0x137   : > { %v1701_v57 = vadd.f32 %v1688_v17, %v1455_v39 }
 0x138   : > { %v1175_v19 = vpop.f32.mrf.mxu1 }
 0x139   : > { %v1711_v38 = vmul.f32 %v2978_v14, %v1701_v57  ;;  %v1186_v55 = vadd.f32 %v1175_v19, %v2968_v2  ;;  %v1693_v7 = vpop.f32.mrf.mxu2 }
 0x13b   : > { %v1721_v25 = vadd.f32 %v2984_v12, %v1711_v38  ;;  %v1321_v23 = vadd.f32 %v1310_v59, %v1186_v55 }
 0x13d   : > { %v1729_v28 = vmax.f32 %v1721_v25, 0.0  ;;  %v1456_v29 = vadd.f32 %v1445_v22, %v1321_v23 }
 0x13f   : > { %v2507_v31 = vpack.c.bf16 %v1729_v28, %v1728_v27  ;;  %v1702_v33 = vadd.f32 %v1691_v26, %v1456_v29 }
 0x140   : > { %v1177_v32 = vpop.f32.mrf.mxu1 }
 0x141   : > { %2515 = vst [vmem:[%s2994_s23 + $0x10] sm:$0xff] %v2507_v31   ;;  %v1187_v34 = vadd.f32 %v1177_v32, %v941_v30  ;;  %v1712_v37 = vmul.f32 %v2978_v14, %v1702_v33 }
 0x143   : > { %v1322_v2 = vadd.f32 %v1312_v16, %v1187_v34  ;;  %v1722_v42 = vadd.f32 %v2984_v12, %v1712_v37 }
 0x145   : > { %v1457_v58 = vadd.f32 %v1447_v35, %v1322_v2  ;;  %v1730_v5 = vmax.f32 %v1722_v42, 0.0 }
 0x147   : > { %v1703_v40 = vadd.f32 %v1693_v7, %v1457_v58 }
 0x149   : > { %v1713_v44 = vmul.f32 %v2978_v14, %v1703_v40 }
 0x14b   : > { %v1723_v45 = vadd.f32 %v2984_v12, %v1713_v44 }
 0x14d   : > { %v1731_v46 = vmax.f32 %v1723_v45, 0.0 }
 0x14f   : > { %v2512_v36 = vpack.c.bf16 %v1731_v46, %v1730_v5 }
 0x151   : > { %2516 = vst [vmem:[%s2994_s23 + $0x18] sm:$0xff] %v2512_v36  }
 0x152 PF: > { %s13_s12 = sadd.s32 1, %s2550_s12  }
 0x153   : > { %p10_p4 = scmp.ge.s32.totalorder %s13_s12, 4  }
 0x155   :  { %12 = sbr.rel (!%p10_p4) target bundleno = 1 (0x1), region = 75 }

</bundles_post_ra>
